<compile_context>
chip_gen: v7x
topology: tpu7x:2x2x1
jax: 0.10.0
libtpu: 0.0.40
codegen_flags: <defaults>
</compile_context>

<pallas_src>
import jax
import jax.numpy as jnp
from jax import lax
from jax.experimental import pallas as pl
from jax.experimental.pallas import tpu as pltpu


# ----------------------------------------------------------------------------
# Kernel 1: fused multi-layer LSTM + online-softmax attention
# ----------------------------------------------------------------------------
def _make_lstm_attn_kernel(L, S, B, E, H, unroll=True):
    G = 4 * H

    def kernel(*refs):
        emb_ref = refs[0]                        # (S*B, E)   time-major flat embeddings
        wih_refs = refs[1:1 + L]                 # each (in_dim, 4H), columns [i|f|g|o]
        whh_refs = refs[1 + L:1 + 2 * L]         # each (H, 4H)
        b_refs = refs[1 + 2 * L:1 + 3 * L]       # each (1, 4H)   (b_ih + b_hh)
        watt_ref = refs[1 + 3 * L]               # (1, H)
        batt_ref = refs[2 + 3 * L]               # (1, 1)
        lstm_ref = refs[3 + 3 * L]               # OUT (S*B, H)  last-layer hidden states
        att_ref = refs[4 + 3 * L]                # OUT (B, H)    attended context
        hN_ref = refs[5 + 3 * L]                 # OUT (L, B, H)
        cN_ref = refs[6 + 3 * L]                 # OUT (L, B, H)
        xproj_ref = refs[7 + 3 * L]              # scratch (S*B, 4H) hoisted input proj
        xbuf_ref = refs[8 + 3 * L]               # scratch (S*B, H)  intermediate layers

        watt_row = watt_ref[...]                 # (1, H)
        batt = batt_ref[...]                     # (1, 1)

        for layer in range(L):
            is_last = layer == L - 1
            src_ref = emb_ref if layer == 0 else xbuf_ref
            dst_ref = lstm_ref if is_last else xbuf_ref

            # Hoisted input projection: one MXU-friendly matmul per layer, bias folded in.
            xproj_ref[...] = (
                jnp.dot(src_ref[...], wih_refs[layer][...],
                        preferred_element_type=jnp.float32)
                + b_refs[layer][...])
            whh = whh_refs[layer][...]           # (H, 4H), resident across the loop

            def step(t, carry, whh=whh, dst=dst_ref, is_last=is_last):
                if is_last:
                    h, c, m, l, acc = carry
                else:
                    h, c = carry
                r0 = pl.multiple_of(t * B, B)
                # single fused-gate matmul on the recurrence critical path
                gates = xproj_ref[pl.ds(r0, B), :] + jnp.dot(
                    h, whh, preferred_element_type=jnp.float32)        # (B, 4H)
                i_g = jax.nn.sigmoid(gates[:, 0 * H:1 * H])
                f_g = jax.nn.sigmoid(gates[:, 1 * H:2 * H])
                g_g = jnp.tanh(gates[:, 2 * H:3 * H])
                o_g = jax.nn.sigmoid(gates[:, 3 * H:4 * H])
                c_new = f_g * c + i_g * g_g
                h_new = o_g * jnp.tanh(c_new)
                dst[pl.ds(r0, B), :] = h_new
                if not is_last:
                    return (h_new, c_new)
                # Online softmax attention over the sequence axis (last layer only).
                # exp() rides the EUP slot; the rest is a handful of (B,H) VPU ops.
                s_t = jnp.sum(h_new * watt_row, axis=-1, keepdims=True) + batt  # (B, 1)
                m_new = jnp.maximum(m, s_t)
                a = jnp.exp(m - m_new)
                p = jnp.exp(s_t - m_new)
                return (h_new, c_new, m_new, a * l + p, a * acc + p * h_new)

            h0 = jnp.zeros((B, H), jnp.float32)      # hidden=None -> zeros
            c0 = jnp.zeros((B, H), jnp.float32)
            if is_last:
                init = (h0, c0,
                        jnp.full((B, 1), -jnp.inf, jnp.float32),
                        jnp.zeros((B, 1), jnp.float32),
                        jnp.zeros((B, H), jnp.float32))
                hL, cL, _m, l_f, acc_f = lax.fori_loop(0, S, step, init, unroll=unroll)
                att_ref[...] = acc_f / l_f
            else:
                hL, cL = lax.fori_loop(0, S, step, (h0, c0), unroll=unroll)
            hN_ref[layer] = hL
            cN_ref[layer] = cL

    return kernel


# ----------------------------------------------------------------------------
# Kernel 2: lane-dense FC epilogue, vocab-tiled grid ("parallel" for megacore)
# ----------------------------------------------------------------------------
def _fc_kernel(x_ref, w_ref, b_ref, out_ref):
    out_ref[...] = (jnp.dot(x_ref[...], w_ref[...],
                            preferred_element_type=jnp.float32)
                    + b_ref[...])


def init_params(key, vocab_size, embedding_dim, hidden_dim, num_layers):
    """Deterministic synthetic parameters with PyTorch-equivalent shapes."""
    keys = list(jax.random.split(key, 1 + 4 * num_layers + 4))
    ki = iter(keys)
    params = {}
    params["embedding"] = 0.1 * jax.random.normal(
        next(ki), (vocab_size, embedding_dim), jnp.float32)
    s = 1.0 / (hidden_dim ** 0.5)
    params["lstm"] = []
    for l in range(num_layers):
        in_dim = embedding_dim if l == 0 else hidden_dim
        w_ih = jax.random.uniform(next(ki), (4 * hidden_dim, in_dim), jnp.float32, -s, s)
        w_hh = jax.random.uniform(next(ki), (4 * hidden_dim, hidden_dim), jnp.float32, -s, s)
        b_ih = jax.random.uniform(next(ki), (4 * hidden_dim,), jnp.float32, -s, s)
        b_hh = jax.random.uniform(next(ki), (4 * hidden_dim,), jnp.float32, -s, s)
        params["lstm"].append((w_ih, w_hh, b_ih, b_hh))
    params["att_w"] = jax.random.uniform(next(ki), (1, hidden_dim), jnp.float32, -s, s)
    params["att_b"] = jax.random.uniform(next(ki), (1,), jnp.float32, -s, s)
    sf = 1.0 / ((2 * hidden_dim) ** 0.5)
    params["fc_w"] = jax.random.uniform(next(ki), (vocab_size, 2 * hidden_dim), jnp.float32, -sf, sf)
    params["fc_b"] = jax.random.uniform(next(ki), (vocab_size,), jnp.float32, -sf, sf)
    return params


def next_word_predictor_forward(input_ids, params):
    B, S = input_ids.shape
    emb_table = params["embedding"]
    E = emb_table.shape[1]
    L = len(params["lstm"])
    H = params["lstm"][0][1].shape[1]
    V = params["fc_w"].shape[0]
    BS = B * S

    # Embedding lookup (XLA glue). Dropout(p=0.3) is identity in eval mode.
    emb = jnp.take(emb_table, input_ids, axis=0).astype(jnp.float32)      # (B, S, E)
    # time-major flat layout (S*B, E): row t*B + b  (layout plumbing only).
    emb_tm = jnp.transpose(emb, (1, 0, 2)).reshape(S * B, E)

    # Fuse the 4 gates: PyTorch (4H, in) row-blocks [i;f;g;o] -> transposed (in, 4H)
    # so a single matmul produces all gates with columns [i|f|g|o].
    wih_list, whh_list, b_list = [], [], []
    for (w_ih, w_hh, b_ih, b_hh) in params["lstm"]:
        wih_list.append(jnp.transpose(w_ih))                  # (in_dim, 4H)
        whh_list.append(jnp.transpose(w_hh))                  # (H, 4H)
        b_list.append((b_ih + b_hh).reshape(1, 4 * H))        # (1, 4H)

    watt = params["att_w"]                                    # (1, H)
    batt = params["att_b"].reshape(1, 1)                      # (1, 1)

    inputs = [emb_tm] + wih_list + whh_list + b_list + [watt, batt]
    vmem = pl.BlockSpec(memory_space=pltpu.MemorySpace.VMEM)

    lstm_tm, attended, h_n, c_n = pl.pallas_call(
        _make_lstm_attn_kernel(L, S, B, E, H, unroll=(S <= 32)),
        out_shape=(
            jax.ShapeDtypeStruct((S * B, H), jnp.float32),    # last-layer states, time-major flat
            jax.ShapeDtypeStruct((B, H), jnp.float32),        # attended context
            jax.ShapeDtypeStruct((L, B, H), jnp.float32),     # h_n
            jax.ShapeDtypeStruct((L, B, H), jnp.float32),     # c_n
        ),
        in_specs=[vmem] * len(inputs),
        out_specs=(vmem, vmem, vmem, vmem),
        scratch_shapes=[
            pltpu.VMEM((S * B, 4 * H), jnp.float32),          # hoisted input projection
            pltpu.VMEM((S * B, H), jnp.float32),              # inter-layer activations
        ],
    )(*inputs)

    # ---------------- FC epilogue (kernel 2) ----------------
    # Build the lane-dense (B*S, 2H) input slab in batch-major order (layout plumbing):
    # row b*S + t = [lstm_out[b, t, :], attended[b, :]]  ==  torch.cat([...], dim=-1).
    lstm_bm = lstm_tm.reshape(S, B, H).transpose(1, 0, 2).reshape(BS, H)
    att_exp = jnp.repeat(attended, S, axis=0)                 # (B*S, H)
    x_fc = jnp.concatenate([lstm_bm, att_exp], axis=1)        # (B*S, 2H)

    # Pad vocab to a multiple of 128 for unmasked, lane-dense stores / full MXU columns.
    Vpad = ((V + 127) // 128) * 128
    wfc = jnp.pad(jnp.transpose(params["fc_w"]), ((0, 0), (0, Vpad - V)))   # (2H, Vpad)
    bfc = jnp.pad(params["fc_b"], (0, Vpad - V)).reshape(1, Vpad)           # (1, Vpad)

    # Vocab tile: biggest of a simple ladder that divides Vpad (re-derive per generation
    # for realistic vocab sizes / VMEM budgets; 128-multiples work on v5e/v6e/v7x).
    TV = next(t for t in (2048, 1024, 512, 256, 128) if Vpad % t == 0)

    logits_flat = pl.pallas_call(
        _fc_kernel,
        out_shape=jax.ShapeDtypeStruct((BS, Vpad), jnp.float32),
        grid=(Vpad // TV,),
        in_specs=[
            pl.BlockSpec((BS, 2 * H), lambda j: (0, 0)),      # activations resident
            pl.BlockSpec((2 * H, TV), lambda j: (0, j)),      # weight tile (pipelined DMA)
            pl.BlockSpec((1, TV), lambda j: (0, j)),          # bias tile
        ],
        out_specs=pl.BlockSpec((BS, TV), lambda j: (0, j)),   # lane-dense output tile
        compiler_params=pltpu.CompilerParams(
            dimension_semantics=("parallel",)),               # shard vocab tiles across TCs
    )(x_fc, wfc, bfc)

    logits = logits_flat[:, :V].reshape(B, S, V)
    return logits, (h_n, c_n)


# ----------------------------------------------------------------------------
# Pure-JAX reference (mirrors the PyTorch forward) for a correctness check
# ----------------------------------------------------------------------------
def _reference_forward(input_ids, params):
    B, S = input_ids.shape
    L = len(params["lstm"])
    H = params["lstm"][0][1].shape[1]
    x = jnp.take(params["embedding"], input_ids, axis=0).astype(jnp.float32)  # (B,S,E)
    h_list, c_list = [], []
    for (w_ih, w_hh, b_ih, b_hh) in params["lstm"]:
        h = jnp.zeros((B, H), jnp.float32)
        c = jnp.zeros((B, H), jnp.float32)
        outs = []
        for t in range(S):
            g = x[:, t, :] @ w_ih.T + h @ w_hh.T + b_ih + b_hh
            i = jax.nn.sigmoid(g[:, :H])
            f = jax.nn.sigmoid(g[:, H:2 * H])
            gg = jnp.tanh(g[:, 2 * H:3 * H])
            o = jax.nn.sigmoid(g[:, 3 * H:])
            c = f * c + i * gg
            h = o * jnp.tanh(c)
            outs.append(h)
        x = jnp.stack(outs, axis=1)
        h_list.append(h)
        c_list.append(c)
    lstm_out = x                                                              # (B,S,H)
    scores = lstm_out @ params["att_w"].T + params["att_b"]                   # (B,S,1)
    attn = jax.nn.softmax(scores, axis=1)
    attended = jnp.einsum("bs,bsh->bh", attn[..., 0], lstm_out)               # (B,H)
    combined = jnp.concatenate(
        [lstm_out, jnp.broadcast_to(attended[:, None, :], lstm_out.shape)], axis=-1)
    logits = combined @ params["fc_w"].T + params["fc_b"]
    return logits, (jnp.stack(h_list), jnp.stack(c_list))


if __name__ == "__main__":
    vocab_size = 64
    embedding_dim = 16
    hidden_dim = 32
    num_layers = 2
    batch, seq_len = 2, 8

    key = jax.random.PRNGKey(0)
    k_params, k_ids = jax.random.split(key)
    params = init_params(k_params, vocab_size, embedding_dim, hidden_dim, num_layers)
    input_ids = jax.random.randint(k_ids, (batch, seq_len), 0, vocab_size, dtype=jnp.int32)

    fwd = jax.jit(next_word_predictor_forward)
    logits, (h_n, c_n) = fwd(input_ids, params)
    jax.block_until_ready((logits, h_n, c_n))

    assert logits.shape == (batch, seq_len, vocab_size)
    assert h_n.shape == (num_layers, batch, hidden_dim)
    assert c_n.shape == (num_layers, batch, hidden_dim)
    assert bool(jnp.all(jnp.isfinite(logits)))

    ref_logits, (ref_h, ref_c) = _reference_forward(input_ids, params)
    assert bool(jnp.allclose(logits, ref_logits, rtol=2e-2, atol=2e-2))
    assert bool(jnp.allclose(h_n, ref_h, rtol=2e-2, atol=2e-2))
    assert bool(jnp.allclose(c_n, ref_c, rtol=2e-2, atol=2e-2))

    print("KERNEL_OK")
</pallas_src>

<mosaic_0001>
module attributes {stable_mosaic.version = 11 : i64} {
  func.func @kernel(%arg0: memref<16x16xf32, #tpu.memory_space<vmem>>, %arg1: memref<16x128xf32, #tpu.memory_space<vmem>>, %arg2: memref<32x128xf32, #tpu.memory_space<vmem>>, %arg3: memref<32x128xf32, #tpu.memory_space<vmem>>, %arg4: memref<32x128xf32, #tpu.memory_space<vmem>>, %arg5: memref<1x128xf32, #tpu.memory_space<vmem>>, %arg6: memref<1x128xf32, #tpu.memory_space<vmem>>, %arg7: memref<1x32xf32, #tpu.memory_space<vmem>>, %arg8: memref<1x1xf32, #tpu.memory_space<vmem>>, %arg9: memref<16x32xf32, #tpu.memory_space<vmem>>, %arg10: memref<2x32xf32, #tpu.memory_space<vmem>>, %arg11: memref<2x2x32xf32, #tpu.memory_space<vmem>>, %arg12: memref<2x2x32xf32, #tpu.memory_space<vmem>>, %arg13: memref<16x128xf32, #tpu.memory_space<vmem>>, %arg14: memref<16x32xf32, #tpu.memory_space<vmem>>) attributes {dimension_semantics = [], scalar_prefetch = 0 : i64, scratch_operands = 2 : i64, tpu.core_type = #tpu.core_type<tc>} {
    %c0 = arith.constant 0 : index
    %c0_0 = arith.constant 0 : index
    %0 = vector.load %arg7[%c0, %c0_0] : memref<1x32xf32, #tpu.memory_space<vmem>>, vector<1x32xf32>
    %c0_1 = arith.constant 0 : index
    %c0_2 = arith.constant 0 : index
    %1 = vector.load %arg8[%c0_1, %c0_2] : memref<1x1xf32, #tpu.memory_space<vmem>>, vector<1x1xf32>
    %c0_3 = arith.constant 0 : index
    %c0_4 = arith.constant 0 : index
    %2 = vector.load %arg0[%c0_3, %c0_4] : memref<16x16xf32, #tpu.memory_space<vmem>>, vector<16x16xf32>
    %c0_5 = arith.constant 0 : index
    %c0_6 = arith.constant 0 : index
    %3 = vector.load %arg1[%c0_5, %c0_6] : memref<16x128xf32, #tpu.memory_space<vmem>>, vector<16x128xf32>
    %cst = arith.constant dense<0.000000e+00> : vector<16x128xf32>
    %4 = tpu.matmul %2, %3, %cst {dimension_numbers = #tpu.dot_dimension_numbers<[1], [0], [0], [1], [0, 0, 1, 1], [], []>} : vector<16x16xf32>, vector<16x128xf32>, vector<16x128xf32> -> vector<16x128xf32>
    %c0_7 = arith.constant 0 : index
    %c0_8 = arith.constant 0 : index
    %5 = vector.load %arg5[%c0_7, %c0_8] : memref<1x128xf32, #tpu.memory_space<vmem>>, vector<1x128xf32>
    %6 = vector.broadcast %5 : vector<1x128xf32> to vector<16x128xf32>
    %7 = arith.addf %4, %6 : vector<16x128xf32>
    %c0_9 = arith.constant 0 : index
    %c0_10 = arith.constant 0 : index
    %8 = vector.load %arg13[%c0_9, %c0_10] : memref<16x128xf32, #tpu.memory_space<vmem>>, vector<16x128xf32>
    tpu.vector_store %arg13[%c0_9, %c0_10], %7 {strides = array<i32>} : memref<16x128xf32, #tpu.memory_space<vmem>>, vector<16x128xf32>,
    %c0_11 = arith.constant 0 : index
    %c0_12 = arith.constant 0 : index
    %9 = vector.load %arg3[%c0_11, %c0_12] : memref<32x128xf32, #tpu.memory_space<vmem>>, vector<32x128xf32>
    %cst_13 = arith.constant 0.000000e+00 : f32
    %10 = vector.broadcast %cst_13 : f32 to vector<2x32xf32>
    %cst_14 = arith.constant 0.000000e+00 : f32
    %11 = vector.broadcast %cst_14 : f32 to vector<2x32xf32>
    %c0_i32 = arith.constant 0 : i32
    %c2_i32 = arith.constant 2 : i32
    %12 = arith.muli %c0_i32, %c2_i32 : i32
    %13 = tpu.assume_multiple %12, 2 : i32
    %14 = arith.index_cast %13 : i32 to index
    %c0_15 = arith.constant 0 : index
    %15 = vector.load %arg13[%14, %c0_15] : memref<16x128xf32, #tpu.memory_space<vmem>>, vector<2x128xf32>
    %cst_16 = arith.constant dense<0.000000e+00> : vector<2x128xf32>
    %16 = tpu.matmul %10, %9, %cst_16 {dimension_numbers = #tpu.dot_dimension_numbers<[1], [0], [0], [1], [0, 0, 1, 1], [], []>} : vector<2x32xf32>, vector<32x128xf32>, vector<2x128xf32> -> vector<2x128xf32>
    %17 = arith.addf %15, %16 : vector<2x128xf32>
    %18 = vector.extract_strided_slice %17 {offsets = [0, 0], sizes = [2, 32], strides = [1, 1]} : vector<2x128xf32> to vector<2x32xf32>
    %19 = arith.negf %18 : vector<2x32xf32>
    %20 = math.exp %19 : vector<2x32xf32>
    %cst_17 = arith.constant 1.000000e+00 : f32
    %21 = vector.broadcast %cst_17 : f32 to vector<2x32xf32>
    %22 = arith.addf %21, %20 : vector<2x32xf32>
    %23 = arith.divf %21, %22 : vector<2x32xf32>
    %24 = vector.extract_strided_slice %17 {offsets = [0, 32], sizes = [2, 32], strides = [1, 1]} : vector<2x128xf32> to vector<2x32xf32>
    %25 = arith.negf %24 : vector<2x32xf32>
    %26 = math.exp %25 : vector<2x32xf32>
    %cst_18 = arith.constant 1.000000e+00 : f32
    %27 = vector.broadcast %cst_18 : f32 to vector<2x32xf32>
    %28 = arith.addf %27, %26 : vector<2x32xf32>
    %29 = arith.divf %27, %28 : vector<2x32xf32>
    %30 = vector.extract_strided_slice %17 {offsets = [0, 64], sizes = [2, 32], strides = [1, 1]} : vector<2x128xf32> to vector<2x32xf32>
    %31 = math.tanh %30 : vector<2x32xf32>
    %32 = vector.extract_strided_slice %17 {offsets = [0, 96], sizes = [2, 32], strides = [1, 1]} : vector<2x128xf32> to vector<2x32xf32>
    %33 = arith.negf %32 : vector<2x32xf32>
    %34 = math.exp %33 : vector<2x32xf32>
    %cst_19 = arith.constant 1.000000e+00 : f32
    %35 = vector.broadcast %cst_19 : f32 to vector<2x32xf32>
    %36 = arith.addf %35, %34 : vector<2x32xf32>
    %37 = arith.divf %35, %36 : vector<2x32xf32>
    %38 = arith.mulf %29, %11 : vector<2x32xf32>
    %39 = arith.mulf %23, %31 : vector<2x32xf32>
    %40 = arith.addf %38, %39 : vector<2x32xf32>
    %41 = math.tanh %40 : vector<2x32xf32>
    %42 = arith.mulf %37, %41 : vector<2x32xf32>
    %43 = arith.index_cast %13 : i32 to index
    %c0_20 = arith.constant 0 : index
    %44 = vector.load %arg14[%43, %c0_20] : memref<16x32xf32, #tpu.memory_space<vmem>>, vector<2x32xf32>
    tpu.vector_store %arg14[%43, %c0_20], %42 {strides = array<i32>} : memref<16x32xf32, #tpu.memory_space<vmem>>, vector<2x32xf32>,
    %c1_i32 = arith.constant 1 : i32
    %c2_i32_21 = arith.constant 2 : i32
    %45 = arith.muli %c1_i32, %c2_i32_21 : i32
    %46 = tpu.assume_multiple %45, 2 : i32
    %47 = arith.index_cast %46 : i32 to index
    %c0_22 = arith.constant 0 : index
    %48 = vector.load %arg13[%47, %c0_22] : memref<16x128xf32, #tpu.memory_space<vmem>>, vector<2x128xf32>
    %cst_23 = arith.constant dense<0.000000e+00> : vector<2x128xf32>
    %49 = tpu.matmul %42, %9, %cst_23 {dimension_numbers = #tpu.dot_dimension_numbers<[1], [0], [0], [1], [0, 0, 1, 1], [], []>} : vector<2x32xf32>, vector<32x128xf32>, vector<2x128xf32> -> vector<2x128xf32>
    %50 = arith.addf %48, %49 : vector<2x128xf32>
    %51 = vector.extract_strided_slice %50 {offsets = [0, 0], sizes = [2, 32], strides = [1, 1]} : vector<2x128xf32> to vector<2x32xf32>
    %52 = arith.negf %51 : vector<2x32xf32>
    %53 = math.exp %52 : vector<2x32xf32>
    %cst_24 = arith.constant 1.000000e+00 : f32
    %54 = vector.broadcast %cst_24 : f32 to vector<2x32xf32>
    %55 = arith.addf %54, %53 : vector<2x32xf32>
    %56 = arith.divf %54, %55 : vector<2x32xf32>
    %57 = vector.extract_strided_slice %50 {offsets = [0, 32], sizes = [2, 32], strides = [1, 1]} : vector<2x128xf32> to vector<2x32xf32>
    %58 = arith.negf %57 : vector<2x32xf32>
    %59 = math.exp %58 : vector<2x32xf32>
    %cst_25 = arith.constant 1.000000e+00 : f32
    %60 = vector.broadcast %cst_25 : f32 to vector<2x32xf32>
    %61 = arith.addf %60, %59 : vector<2x32xf32>
    %62 = arith.divf %60, %61 : vector<2x32xf32>
    %63 = vector.extract_strided_slice %50 {offsets = [0, 64], sizes = [2, 32], strides = [1, 1]} : vector<2x128xf32> to vector<2x32xf32>
    %64 = math.tanh %63 : vector<2x32xf32>
    %65 = vector.extract_strided_slice %50 {offsets = [0, 96], sizes = [2, 32], strides = [1, 1]} : vector<2x128xf32> to vector<2x32xf32>
    %66 = arith.negf %65 : vector<2x32xf32>
    %67 = math.exp %66 : vector<2x32xf32>
    %cst_26 = arith.constant 1.000000e+00 : f32
    %68 = vector.broadcast %cst_26 : f32 to vector<2x32xf32>
    %69 = arith.addf %68, %67 : vector<2x32xf32>
    %70 = arith.divf %68, %69 : vector<2x32xf32>
    %71 = arith.mulf %62, %40 : vector<2x32xf32>
    %72 = arith.mulf %56, %64 : vector<2x32xf32>
    %73 = arith.addf %71, %72 : vector<2x32xf32>
    %74 = math.tanh %73 : vector<2x32xf32>
    %75 = arith.mulf %70, %74 : vector<2x32xf32>
    %76 = arith.index_cast %46 : i32 to index
    %c0_27 = arith.constant 0 : index
    %77 = vector.load %arg14[%76, %c0_27] : memref<16x32xf32, #tpu.memory_space<vmem>>, vector<2x32xf32>
    tpu.vector_store %arg14[%76, %c0_27], %75 {strides = array<i32>} : memref<16x32xf32, #tpu.memory_space<vmem>>, vector<2x32xf32>,
    %c2_i32_28 = arith.constant 2 : i32
    %c2_i32_29 = arith.constant 2 : i32
    %78 = arith.muli %c2_i32_28, %c2_i32_29 : i32
    %79 = tpu.assume_multiple %78, 2 : i32
    %80 = arith.index_cast %79 : i32 to index
    %c0_30 = arith.constant 0 : index
    %81 = vector.load %arg13[%80, %c0_30] : memref<16x128xf32, #tpu.memory_space<vmem>>, vector<2x128xf32>
    %cst_31 = arith.constant dense<0.000000e+00> : vector<2x128xf32>
    %82 = tpu.matmul %75, %9, %cst_31 {dimension_numbers = #tpu.dot_dimension_numbers<[1], [0], [0], [1], [0, 0, 1, 1], [], []>} : vector<2x32xf32>, vector<32x128xf32>, vector<2x128xf32> -> vector<2x128xf32>
    %83 = arith.addf %81, %82 : vector<2x128xf32>
    %84 = vector.extract_strided_slice %83 {offsets = [0, 0], sizes = [2, 32], strides = [1, 1]} : vector<2x128xf32> to vector<2x32xf32>
    %85 = arith.negf %84 : vector<2x32xf32>
    %86 = math.exp %85 : vector<2x32xf32>
    %cst_32 = arith.constant 1.000000e+00 : f32
    %87 = vector.broadcast %cst_32 : f32 to vector<2x32xf32>
    %88 = arith.addf %87, %86 : vector<2x32xf32>
    %89 = arith.divf %87, %88 : vector<2x32xf32>
    %90 = vector.extract_strided_slice %83 {offsets = [0, 32], sizes = [2, 32], strides = [1, 1]} : vector<2x128xf32> to vector<2x32xf32>
    %91 = arith.negf %90 : vector<2x32xf32>
    %92 = math.exp %91 : vector<2x32xf32>
    %cst_33 = arith.constant 1.000000e+00 : f32
    %93 = vector.broadcast %cst_33 : f32 to vector<2x32xf32>
    %94 = arith.addf %93, %92 : vector<2x32xf32>
    %95 = arith.divf %93, %94 : vector<2x32xf32>
    %96 = vector.extract_strided_slice %83 {offsets = [0, 64], sizes = [2, 32], strides = [1, 1]} : vector<2x128xf32> to vector<2x32xf32>
    %97 = math.tanh %96 : vector<2x32xf32>
    %98 = vector.extract_strided_slice %83 {offsets = [0, 96], sizes = [2, 32], strides = [1, 1]} : vector<2x128xf32> to vector<2x32xf32>
    %99 = arith.negf %98 : vector<2x32xf32>
    %100 = math.exp %99 : vector<2x32xf32>
    %cst_34 = arith.constant 1.000000e+00 : f32
    %101 = vector.broadcast %cst_34 : f32 to vector<2x32xf32>
    %102 = arith.addf %101, %100 : vector<2x32xf32>
    %103 = arith.divf %101, %102 : vector<2x32xf32>
    %104 = arith.mulf %95, %73 : vector<2x32xf32>
    %105 = arith.mulf %89, %97 : vector<2x32xf32>
    %106 = arith.addf %104, %105 : vector<2x32xf32>
    %107 = math.tanh %106 : vector<2x32xf32>
    %108 = arith.mulf %103, %107 : vector<2x32xf32>
    %109 = arith.index_cast %79 : i32 to index
    %c0_35 = arith.constant 0 : index
    %110 = vector.load %arg14[%109, %c0_35] : memref<16x32xf32, #tpu.memory_space<vmem>>, vector<2x32xf32>
    tpu.vector_store %arg14[%109, %c0_35], %108 {strides = array<i32>} : memref<16x32xf32, #tpu.memory_space<vmem>>, vector<2x32xf32>,
    %c3_i32 = arith.constant 3 : i32
    %c2_i32_36 = arith.constant 2 : i32
    %111 = arith.muli %c3_i32, %c2_i32_36 : i32
    %112 = tpu.assume_multiple %111, 2 : i32
    %113 = arith.index_cast %112 : i32 to index
    %c0_37 = arith.constant 0 : index
    %114 = vector.load %arg13[%113, %c0_37] : memref<16x128xf32, #tpu.memory_space<vmem>>, vector<2x128xf32>
    %cst_38 = arith.constant dense<0.000000e+00> : vector<2x128xf32>
    %115 = tpu.matmul %108, %9, %cst_38 {dimension_numbers = #tpu.dot_dimension_numbers<[1], [0], [0], [1], [0, 0, 1, 1], [], []>} : vector<2x32xf32>, vector<32x128xf32>, vector<2x128xf32> -> vector<2x128xf32>
    %116 = arith.addf %114, %115 : vector<2x128xf32>
    %117 = vector.extract_strided_slice %116 {offsets = [0, 0], sizes = [2, 32], strides = [1, 1]} : vector<2x128xf32> to vector<2x32xf32>
    %118 = arith.negf %117 : vector<2x32xf32>
    %119 = math.exp %118 : vector<2x32xf32>
    %cst_39 = arith.constant 1.000000e+00 : f32
    %120 = vector.broadcast %cst_39 : f32 to vector<2x32xf32>
    %121 = arith.addf %120, %119 : vector<2x32xf32>
    %122 = arith.divf %120, %121 : vector<2x32xf32>
    %123 = vector.extract_strided_slice %116 {offsets = [0, 32], sizes = [2, 32], strides = [1, 1]} : vector<2x128xf32> to vector<2x32xf32>
    %124 = arith.negf %123 : vector<2x32xf32>
    %125 = math.exp %124 : vector<2x32xf32>
    %cst_40 = arith.constant 1.000000e+00 : f32
    %126 = vector.broadcast %cst_40 : f32 to vector<2x32xf32>
    %127 = arith.addf %126, %125 : vector<2x32xf32>
    %128 = arith.divf %126, %127 : vector<2x32xf32>
    %129 = vector.extract_strided_slice %116 {offsets = [0, 64], sizes = [2, 32], strides = [1, 1]} : vector<2x128xf32> to vector<2x32xf32>
    %130 = math.tanh %129 : vector<2x32xf32>
    %131 = vector.extract_strided_slice %116 {offsets = [0, 96], sizes = [2, 32], strides = [1, 1]} : vector<2x128xf32> to vector<2x32xf32>
    %132 = arith.negf %131 : vector<2x32xf32>
    %133 = math.exp %132 : vector<2x32xf32>
    %cst_41 = arith.constant 1.000000e+00 : f32
    %134 = vector.broadcast %cst_41 : f32 to vector<2x32xf32>
    %135 = arith.addf %134, %133 : vector<2x32xf32>
    %136 = arith.divf %134, %135 : vector<2x32xf32>
    %137 = arith.mulf %128, %106 : vector<2x32xf32>
    %138 = arith.mulf %122, %130 : vector<2x32xf32>
    %139 = arith.addf %137, %138 : vector<2x32xf32>
    %140 = math.tanh %139 : vector<2x32xf32>
    %141 = arith.mulf %136, %140 : vector<2x32xf32>
    %142 = arith.index_cast %112 : i32 to index
    %c0_42 = arith.constant 0 : index
    %143 = vector.load %arg14[%142, %c0_42] : memref<16x32xf32, #tpu.memory_space<vmem>>, vector<2x32xf32>
    tpu.vector_store %arg14[%142, %c0_42], %141 {strides = array<i32>} : memref<16x32xf32, #tpu.memory_space<vmem>>, vector<2x32xf32>,
    %c4_i32 = arith.constant 4 : i32
    %c2_i32_43 = arith.constant 2 : i32
    %144 = arith.muli %c4_i32, %c2_i32_43 : i32
    %145 = tpu.assume_multiple %144, 2 : i32
    %146 = arith.index_cast %145 : i32 to index
    %c0_44 = arith.constant 0 : index
    %147 = vector.load %arg13[%146, %c0_44] : memref<16x128xf32, #tpu.memory_space<vmem>>, vector<2x128xf32>
    %cst_45 = arith.constant dense<0.000000e+00> : vector<2x128xf32>
    %148 = tpu.matmul %141, %9, %cst_45 {dimension_numbers = #tpu.dot_dimension_numbers<[1], [0], [0], [1], [0, 0, 1, 1], [], []>} : vector<2x32xf32>, vector<32x128xf32>, vector<2x128xf32> -> vector<2x128xf32>
    %149 = arith.addf %147, %148 : vector<2x128xf32>
    %150 = vector.extract_strided_slice %149 {offsets = [0, 0], sizes = [2, 32], strides = [1, 1]} : vector<2x128xf32> to vector<2x32xf32>
    %151 = arith.negf %150 : vector<2x32xf32>
    %152 = math.exp %151 : vector<2x32xf32>
    %cst_46 = arith.constant 1.000000e+00 : f32
    %153 = vector.broadcast %cst_46 : f32 to vector<2x32xf32>
    %154 = arith.addf %153, %152 : vector<2x32xf32>
    %155 = arith.divf %153, %154 : vector<2x32xf32>
    %156 = vector.extract_strided_slice %149 {offsets = [0, 32], sizes = [2, 32], strides = [1, 1]} : vector<2x128xf32> to vector<2x32xf32>
    %157 = arith.negf %156 : vector<2x32xf32>
    %158 = math.exp %157 : vector<2x32xf32>
    %cst_47 = arith.constant 1.000000e+00 : f32
    %159 = vector.broadcast %cst_47 : f32 to vector<2x32xf32>
    %160 = arith.addf %159, %158 : vector<2x32xf32>
    %161 = arith.divf %159, %160 : vector<2x32xf32>
    %162 = vector.extract_strided_slice %149 {offsets = [0, 64], sizes = [2, 32], strides = [1, 1]} : vector<2x128xf32> to vector<2x32xf32>
    %163 = math.tanh %162 : vector<2x32xf32>
    %164 = vector.extract_strided_slice %149 {offsets = [0, 96], sizes = [2, 32], strides = [1, 1]} : vector<2x128xf32> to vector<2x32xf32>
    %165 = arith.negf %164 : vector<2x32xf32>
    %166 = math.exp %165 : vector<2x32xf32>
    %cst_48 = arith.constant 1.000000e+00 : f32
    %167 = vector.broadcast %cst_48 : f32 to vector<2x32xf32>
    %168 = arith.addf %167, %166 : vector<2x32xf32>
    %169 = arith.divf %167, %168 : vector<2x32xf32>
    %170 = arith.mulf %161, %139 : vector<2x32xf32>
    %171 = arith.mulf %155, %163 : vector<2x32xf32>
    %172 = arith.addf %170, %171 : vector<2x32xf32>
    %173 = math.tanh %172 : vector<2x32xf32>
    %174 = arith.mulf %169, %173 : vector<2x32xf32>
    %175 = arith.index_cast %145 : i32 to index
    %c0_49 = arith.constant 0 : index
    %176 = vector.load %arg14[%175, %c0_49] : memref<16x32xf32, #tpu.memory_space<vmem>>, vector<2x32xf32>
    tpu.vector_store %arg14[%175, %c0_49], %174 {strides = array<i32>} : memref<16x32xf32, #tpu.memory_space<vmem>>, vector<2x32xf32>,
    %c5_i32 = arith.constant 5 : i32
    %c2_i32_50 = arith.constant 2 : i32
    %177 = arith.muli %c5_i32, %c2_i32_50 : i32
    %178 = tpu.assume_multiple %177, 2 : i32
    %179 = arith.index_cast %178 : i32 to index
    %c0_51 = arith.constant 0 : index
    %180 = vector.load %arg13[%179, %c0_51] : memref<16x128xf32, #tpu.memory_space<vmem>>, vector<2x128xf32>
    %cst_52 = arith.constant dense<0.000000e+00> : vector<2x128xf32>
    %181 = tpu.matmul %174, %9, %cst_52 {dimension_numbers = #tpu.dot_dimension_numbers<[1], [0], [0], [1], [0, 0, 1, 1], [], []>} : vector<2x32xf32>, vector<32x128xf32>, vector<2x128xf32> -> vector<2x128xf32>
    %182 = arith.addf %180, %181 : vector<2x128xf32>
    %183 = vector.extract_strided_slice %182 {offsets = [0, 0], sizes = [2, 32], strides = [1, 1]} : vector<2x128xf32> to vector<2x32xf32>
    %184 = arith.negf %183 : vector<2x32xf32>
    %185 = math.exp %184 : vector<2x32xf32>
    %cst_53 = arith.constant 1.000000e+00 : f32
    %186 = vector.broadcast %cst_53 : f32 to vector<2x32xf32>
    %187 = arith.addf %186, %185 : vector<2x32xf32>
    %188 = arith.divf %186, %187 : vector<2x32xf32>
    %189 = vector.extract_strided_slice %182 {offsets = [0, 32], sizes = [2, 32], strides = [1, 1]} : vector<2x128xf32> to vector<2x32xf32>
    %190 = arith.negf %189 : vector<2x32xf32>
    %191 = math.exp %190 : vector<2x32xf32>
    %cst_54 = arith.constant 1.000000e+00 : f32
    %192 = vector.broadcast %cst_54 : f32 to vector<2x32xf32>
    %193 = arith.addf %192, %191 : vector<2x32xf32>
    %194 = arith.divf %192, %193 : vector<2x32xf32>
    %195 = vector.extract_strided_slice %182 {offsets = [0, 64], sizes = [2, 32], strides = [1, 1]} : vector<2x128xf32> to vector<2x32xf32>
    %196 = math.tanh %195 : vector<2x32xf32>
    %197 = vector.extract_strided_slice %182 {offsets = [0, 96], sizes = [2, 32], strides = [1, 1]} : vector<2x128xf32> to vector<2x32xf32>
    %198 = arith.negf %197 : vector<2x32xf32>
    %199 = math.exp %198 : vector<2x32xf32>
    %cst_55 = arith.constant 1.000000e+00 : f32
    %200 = vector.broadcast %cst_55 : f32 to vector<2x32xf32>
    %201 = arith.addf %200, %199 : vector<2x32xf32>
    %202 = arith.divf %200, %201 : vector<2x32xf32>
    %203 = arith.mulf %194, %172 : vector<2x32xf32>
    %204 = arith.mulf %188, %196 : vector<2x32xf32>
    %205 = arith.addf %203, %204 : vector<2x32xf32>
    %206 = math.tanh %205 : vector<2x32xf32>
    %207 = arith.mulf %202, %206 : vector<2x32xf32>
    %208 = arith.index_cast %178 : i32 to index
    %c0_56 = arith.constant 0 : index
    %209 = vector.load %arg14[%208, %c0_56] : memref<16x32xf32, #tpu.memory_space<vmem>>, vector<2x32xf32>
    tpu.vector_store %arg14[%208, %c0_56], %207 {strides = array<i32>} : memref<16x32xf32, #tpu.memory_space<vmem>>, vector<2x32xf32>,
    %c6_i32 = arith.constant 6 : i32
    %c2_i32_57 = arith.constant 2 : i32
    %210 = arith.muli %c6_i32, %c2_i32_57 : i32
    %211 = tpu.assume_multiple %210, 2 : i32
    %212 = arith.index_cast %211 : i32 to index
    %c0_58 = arith.constant 0 : index
    %213 = vector.load %arg13[%212, %c0_58] : memref<16x128xf32, #tpu.memory_space<vmem>>, vector<2x128xf32>
    %cst_59 = arith.constant dense<0.000000e+00> : vector<2x128xf32>
    %214 = tpu.matmul %207, %9, %cst_59 {dimension_numbers = #tpu.dot_dimension_numbers<[1], [0], [0], [1], [0, 0, 1, 1], [], []>} : vector<2x32xf32>, vector<32x128xf32>, vector<2x128xf32> -> vector<2x128xf32>
    %215 = arith.addf %213, %214 : vector<2x128xf32>
    %216 = vector.extract_strided_slice %215 {offsets = [0, 0], sizes = [2, 32], strides = [1, 1]} : vector<2x128xf32> to vector<2x32xf32>
    %217 = arith.negf %216 : vector<2x32xf32>
    %218 = math.exp %217 : vector<2x32xf32>
    %cst_60 = arith.constant 1.000000e+00 : f32
    %219 = vector.broadcast %cst_60 : f32 to vector<2x32xf32>
    %220 = arith.addf %219, %218 : vector<2x32xf32>
    %221 = arith.divf %219, %220 : vector<2x32xf32>
    %222 = vector.extract_strided_slice %215 {offsets = [0, 32], sizes = [2, 32], strides = [1, 1]} : vector<2x128xf32> to vector<2x32xf32>
    %223 = arith.negf %222 : vector<2x32xf32>
    %224 = math.exp %223 : vector<2x32xf32>
    %cst_61 = arith.constant 1.000000e+00 : f32
    %225 = vector.broadcast %cst_61 : f32 to vector<2x32xf32>
    %226 = arith.addf %225, %224 : vector<2x32xf32>
    %227 = arith.divf %225, %226 : vector<2x32xf32>
    %228 = vector.extract_strided_slice %215 {offsets = [0, 64], sizes = [2, 32], strides = [1, 1]} : vector<2x128xf32> to vector<2x32xf32>
    %229 = math.tanh %228 : vector<2x32xf32>
    %230 = vector.extract_strided_slice %215 {offsets = [0, 96], sizes = [2, 32], strides = [1, 1]} : vector<2x128xf32> to vector<2x32xf32>
    %231 = arith.negf %230 : vector<2x32xf32>
    %232 = math.exp %231 : vector<2x32xf32>
    %cst_62 = arith.constant 1.000000e+00 : f32
    %233 = vector.broadcast %cst_62 : f32 to vector<2x32xf32>
    %234 = arith.addf %233, %232 : vector<2x32xf32>
    %235 = arith.divf %233, %234 : vector<2x32xf32>
    %236 = arith.mulf %227, %205 : vector<2x32xf32>
    %237 = arith.mulf %221, %229 : vector<2x32xf32>
    %238 = arith.addf %236, %237 : vector<2x32xf32>
    %239 = math.tanh %238 : vector<2x32xf32>
    %240 = arith.mulf %235, %239 : vector<2x32xf32>
    %241 = arith.index_cast %211 : i32 to index
    %c0_63 = arith.constant 0 : index
    %242 = vector.load %arg14[%241, %c0_63] : memref<16x32xf32, #tpu.memory_space<vmem>>, vector<2x32xf32>
    tpu.vector_store %arg14[%241, %c0_63], %240 {strides = array<i32>} : memref<16x32xf32, #tpu.memory_space<vmem>>, vector<2x32xf32>,
    %c7_i32 = arith.constant 7 : i32
    %c2_i32_64 = arith.constant 2 : i32
    %243 = arith.muli %c7_i32, %c2_i32_64 : i32
    %244 = tpu.assume_multiple %243, 2 : i32
    %245 = arith.index_cast %244 : i32 to index
    %c0_65 = arith.constant 0 : index
    %246 = vector.load %arg13[%245, %c0_65] : memref<16x128xf32, #tpu.memory_space<vmem>>, vector<2x128xf32>
    %cst_66 = arith.constant dense<0.000000e+00> : vector<2x128xf32>
    %247 = tpu.matmul %240, %9, %cst_66 {dimension_numbers = #tpu.dot_dimension_numbers<[1], [0], [0], [1], [0, 0, 1, 1], [], []>} : vector<2x32xf32>, vector<32x128xf32>, vector<2x128xf32> -> vector<2x128xf32>
    %248 = arith.addf %246, %247 : vector<2x128xf32>
    %249 = vector.extract_strided_slice %248 {offsets = [0, 0], sizes = [2, 32], strides = [1, 1]} : vector<2x128xf32> to vector<2x32xf32>
    %250 = arith.negf %249 : vector<2x32xf32>
    %251 = math.exp %250 : vector<2x32xf32>
    %cst_67 = arith.constant 1.000000e+00 : f32
    %252 = vector.broadcast %cst_67 : f32 to vector<2x32xf32>
    %253 = arith.addf %252, %251 : vector<2x32xf32>
    %254 = arith.divf %252, %253 : vector<2x32xf32>
    %255 = vector.extract_strided_slice %248 {offsets = [0, 32], sizes = [2, 32], strides = [1, 1]} : vector<2x128xf32> to vector<2x32xf32>
    %256 = arith.negf %255 : vector<2x32xf32>
    %257 = math.exp %256 : vector<2x32xf32>
    %cst_68 = arith.constant 1.000000e+00 : f32
    %258 = vector.broadcast %cst_68 : f32 to vector<2x32xf32>
    %259 = arith.addf %258, %257 : vector<2x32xf32>
    %260 = arith.divf %258, %259 : vector<2x32xf32>
    %261 = vector.extract_strided_slice %248 {offsets = [0, 64], sizes = [2, 32], strides = [1, 1]} : vector<2x128xf32> to vector<2x32xf32>
    %262 = math.tanh %261 : vector<2x32xf32>
    %263 = vector.extract_strided_slice %248 {offsets = [0, 96], sizes = [2, 32], strides = [1, 1]} : vector<2x128xf32> to vector<2x32xf32>
    %264 = arith.negf %263 : vector<2x32xf32>
    %265 = math.exp %264 : vector<2x32xf32>
    %cst_69 = arith.constant 1.000000e+00 : f32
    %266 = vector.broadcast %cst_69 : f32 to vector<2x32xf32>
    %267 = arith.addf %266, %265 : vector<2x32xf32>
    %268 = arith.divf %266, %267 : vector<2x32xf32>
    %269 = arith.mulf %260, %238 : vector<2x32xf32>
    %270 = arith.mulf %254, %262 : vector<2x32xf32>
    %271 = arith.addf %269, %270 : vector<2x32xf32>
    %272 = math.tanh %271 : vector<2x32xf32>
    %273 = arith.mulf %268, %272 : vector<2x32xf32>
    %274 = arith.index_cast %244 : i32 to index
    %c0_70 = arith.constant 0 : index
    %275 = vector.load %arg14[%274, %c0_70] : memref<16x32xf32, #tpu.memory_space<vmem>>, vector<2x32xf32>
    tpu.vector_store %arg14[%274, %c0_70], %273 {strides = array<i32>} : memref<16x32xf32, #tpu.memory_space<vmem>>, vector<2x32xf32>,
    %c8_i32 = arith.constant 8 : i32
    %c0_71 = arith.constant 0 : index
    %c0_72 = arith.constant 0 : index
    %c0_73 = arith.constant 0 : index
    %276 = vector.load %arg11[%c0_71, %c0_72, %c0_73] : memref<2x2x32xf32, #tpu.memory_space<vmem>>, vector<1x2x32xf32>
    %277 = vector.shape_cast %276 : vector<1x2x32xf32> to vector<2x32xf32>
    %278 = vector.shape_cast %273 : vector<2x32xf32> to vector<1x2x32xf32>
    tpu.vector_store %arg11[%c0_71, %c0_72, %c0_73], %278 {strides = array<i32>} : memref<2x2x32xf32, #tpu.memory_space<vmem>>, vector<1x2x32xf32>,
    %c0_74 = arith.constant 0 : index
    %c0_75 = arith.constant 0 : index
    %c0_76 = arith.constant 0 : index
    %279 = vector.load %arg12[%c0_74, %c0_75, %c0_76] : memref<2x2x32xf32, #tpu.memory_space<vmem>>, vector<1x2x32xf32>
    %280 = vector.shape_cast %279 : vector<1x2x32xf32> to vector<2x32xf32>
    %281 = vector.shape_cast %271 : vector<2x32xf32> to vector<1x2x32xf32>
    tpu.vector_store %arg12[%c0_74, %c0_75, %c0_76], %281 {strides = array<i32>} : memref<2x2x32xf32, #tpu.memory_space<vmem>>, vector<1x2x32xf32>,
    %c0_77 = arith.constant 0 : index
    %c0_78 = arith.constant 0 : index
    %282 = vector.load %arg14[%c0_77, %c0_78] : memref<16x32xf32, #tpu.memory_space<vmem>>, vector<16x32xf32>
    %c0_79 = arith.constant 0 : index
    %c0_80 = arith.constant 0 : index
    %283 = vector.load %arg2[%c0_79, %c0_80] : memref<32x128xf32, #tpu.memory_space<vmem>>, vector<32x128xf32>
    %cst_81 = arith.constant dense<0.000000e+00> : vector<16x128xf32>
    %284 = tpu.matmul %282, %283, %cst_81 {dimension_numbers = #tpu.dot_dimension_numbers<[1], [0], [0], [1], [0, 0, 1, 1], [], []>} : vector<16x32xf32>, vector<32x128xf32>, vector<16x128xf32> -> vector<16x128xf32>
    %c0_82 = arith.constant 0 : index
    %c0_83 = arith.constant 0 : index
    %285 = vector.load %arg6[%c0_82, %c0_83] : memref<1x128xf32, #tpu.memory_space<vmem>>, vector<1x128xf32>
    %286 = vector.broadcast %285 : vector<1x128xf32> to vector<16x128xf32>
    %287 = arith.addf %284, %286 : vector<16x128xf32>
    %c0_84 = arith.constant 0 : index
    %c0_85 = arith.constant 0 : index
    %288 = vector.load %arg13[%c0_84, %c0_85] : memref<16x128xf32, #tpu.memory_space<vmem>>, vector<16x128xf32>
    tpu.vector_store %arg13[%c0_84, %c0_85], %287 {strides = array<i32>} : memref<16x128xf32, #tpu.memory_space<vmem>>, vector<16x128xf32>,
    %c0_86 = arith.constant 0 : index
    %c0_87 = arith.constant 0 : index
    %289 = vector.load %arg4[%c0_86, %c0_87] : memref<32x128xf32, #tpu.memory_space<vmem>>, vector<32x128xf32>
    %cst_88 = arith.constant 0.000000e+00 : f32
    %290 = vector.broadcast %cst_88 : f32 to vector<2x32xf32>
    %cst_89 = arith.constant 0.000000e+00 : f32
    %291 = vector.broadcast %cst_89 : f32 to vector<2x32xf32>
    %cst_90 = arith.constant 0xFF800000 : f32
    %292 = vector.broadcast %cst_90 : f32 to vector<2x1xf32>
    %cst_91 = arith.constant 0.000000e+00 : f32
    %293 = vector.broadcast %cst_91 : f32 to vector<2x1xf32>
    %cst_92 = arith.constant 0.000000e+00 : f32
    %294 = vector.broadcast %cst_92 : f32 to vector<2x32xf32>
    %c0_i32_93 = arith.constant 0 : i32
    %c2_i32_94 = arith.constant 2 : i32
    %295 = arith.muli %c0_i32_93, %c2_i32_94 : i32
    %296 = tpu.assume_multiple %295, 2 : i32
    %297 = arith.index_cast %296 : i32 to index
    %c0_95 = arith.constant 0 : index
    %298 = vector.load %arg13[%297, %c0_95] : memref<16x128xf32, #tpu.memory_space<vmem>>, vector<2x128xf32>
    %cst_96 = arith.constant dense<0.000000e+00> : vector<2x128xf32>
    %299 = tpu.matmul %290, %289, %cst_96 {dimension_numbers = #tpu.dot_dimension_numbers<[1], [0], [0], [1], [0, 0, 1, 1], [], []>} : vector<2x32xf32>, vector<32x128xf32>, vector<2x128xf32> -> vector<2x128xf32>
    %300 = arith.addf %298, %299 : vector<2x128xf32>
    %301 = vector.extract_strided_slice %300 {offsets = [0, 0], sizes = [2, 32], strides = [1, 1]} : vector<2x128xf32> to vector<2x32xf32>
    %302 = arith.negf %301 : vector<2x32xf32>
    %303 = math.exp %302 : vector<2x32xf32>
    %cst_97 = arith.constant 1.000000e+00 : f32
    %304 = vector.broadcast %cst_97 : f32 to vector<2x32xf32>
    %305 = arith.addf %304, %303 : vector<2x32xf32>
    %306 = arith.divf %304, %305 : vector<2x32xf32>
    %307 = vector.extract_strided_slice %300 {offsets = [0, 32], sizes = [2, 32], strides = [1, 1]} : vector<2x128xf32> to vector<2x32xf32>
    %308 = arith.negf %307 : vector<2x32xf32>
    %309 = math.exp %308 : vector<2x32xf32>
    %cst_98 = arith.constant 1.000000e+00 : f32
    %310 = vector.broadcast %cst_98 : f32 to vector<2x32xf32>
    %311 = arith.addf %310, %309 : vector<2x32xf32>
    %312 = arith.divf %310, %311 : vector<2x32xf32>
    %313 = vector.extract_strided_slice %300 {offsets = [0, 64], sizes = [2, 32], strides = [1, 1]} : vector<2x128xf32> to vector<2x32xf32>
    %314 = math.tanh %313 : vector<2x32xf32>
    %315 = vector.extract_strided_slice %300 {offsets = [0, 96], sizes = [2, 32], strides = [1, 1]} : vector<2x128xf32> to vector<2x32xf32>
    %316 = arith.negf %315 : vector<2x32xf32>
    %317 = math.exp %316 : vector<2x32xf32>
    %cst_99 = arith.constant 1.000000e+00 : f32
    %318 = vector.broadcast %cst_99 : f32 to vector<2x32xf32>
    %319 = arith.addf %318, %317 : vector<2x32xf32>
    %320 = arith.divf %318, %319 : vector<2x32xf32>
    %321 = arith.mulf %312, %291 : vector<2x32xf32>
    %322 = arith.mulf %306, %314 : vector<2x32xf32>
    %323 = arith.addf %321, %322 : vector<2x32xf32>
    %324 = math.tanh %323 : vector<2x32xf32>
    %325 = arith.mulf %320, %324 : vector<2x32xf32>
    %326 = arith.index_cast %296 : i32 to index
    %c0_100 = arith.constant 0 : index
    %327 = vector.load %arg9[%326, %c0_100] : memref<16x32xf32, #tpu.memory_space<vmem>>, vector<2x32xf32>
    tpu.vector_store %arg9[%326, %c0_100], %325 {strides = array<i32>} : memref<16x32xf32, #tpu.memory_space<vmem>>, vector<2x32xf32>,
    %328 = vector.broadcast %0 : vector<1x32xf32> to vector<2x32xf32>
    %329 = arith.mulf %325, %328 : vector<2x32xf32>
    %cst_101 = arith.constant dense<0.000000e+00> : vector<2xf32>
    %330 = vector.multi_reduction <add>, %329, %cst_101 [1] : vector<2x32xf32> to vector<2xf32>
    %331 = vector.shape_cast %330 : vector<2xf32> to vector<2x1xf32>
    %332 = vector.broadcast %1 : vector<1x1xf32> to vector<2x1xf32>
    %333 = arith.addf %331, %332 : vector<2x1xf32>
    %334 = arith.maximumf %292, %333 : vector<2x1xf32>
    %335 = arith.subf %292, %334 : vector<2x1xf32>
    %336 = math.exp %335 : vector<2x1xf32>
    %337 = arith.subf %333, %334 : vector<2x1xf32>
    %338 = math.exp %337 : vector<2x1xf32>
    %339 = arith.mulf %336, %293 : vector<2x1xf32>
    %340 = arith.addf %339, %338 : vector<2x1xf32>
    %341 = vector.broadcast %336 : vector<2x1xf32> to vector<2x32xf32>
    %342 = arith.mulf %341, %294 : vector<2x32xf32>
    %343 = vector.broadcast %338 : vector<2x1xf32> to vector<2x32xf32>
    %344 = arith.mulf %343, %325 : vector<2x32xf32>
    %345 = arith.addf %342, %344 : vector<2x32xf32>
    %c1_i32_102 = arith.constant 1 : i32
    %c2_i32_103 = arith.constant 2 : i32
    %346 = arith.muli %c1_i32_102, %c2_i32_103 : i32
    %347 = tpu.assume_multiple %346, 2 : i32
    %348 = arith.index_cast %347 : i32 to index
    %c0_104 = arith.constant 0 : index
    %349 = vector.load %arg13[%348, %c0_104] : memref<16x128xf32, #tpu.memory_space<vmem>>, vector<2x128xf32>
    %cst_105 = arith.constant dense<0.000000e+00> : vector<2x128xf32>
    %350 = tpu.matmul %325, %289, %cst_105 {dimension_numbers = #tpu.dot_dimension_numbers<[1], [0], [0], [1], [0, 0, 1, 1], [], []>} : vector<2x32xf32>, vector<32x128xf32>, vector<2x128xf32> -> vector<2x128xf32>
    %351 = arith.addf %349, %350 : vector<2x128xf32>
    %352 = vector.extract_strided_slice %351 {offsets = [0, 0], sizes = [2, 32], strides = [1, 1]} : vector<2x128xf32> to vector<2x32xf32>
    %353 = arith.negf %352 : vector<2x32xf32>
    %354 = math.exp %353 : vector<2x32xf32>
    %cst_106 = arith.constant 1.000000e+00 : f32
    %355 = vector.broadcast %cst_106 : f32 to vector<2x32xf32>
    %356 = arith.addf %355, %354 : vector<2x32xf32>
    %357 = arith.divf %355, %356 : vector<2x32xf32>
    %358 = vector.extract_strided_slice %351 {offsets = [0, 32], sizes = [2, 32], strides = [1, 1]} : vector<2x128xf32> to vector<2x32xf32>
    %359 = arith.negf %358 : vector<2x32xf32>
    %360 = math.exp %359 : vector<2x32xf32>
    %cst_107 = arith.constant 1.000000e+00 : f32
    %361 = vector.broadcast %cst_107 : f32 to vector<2x32xf32>
    %362 = arith.addf %361, %360 : vector<2x32xf32>
    %363 = arith.divf %361, %362 : vector<2x32xf32>
    %364 = vector.extract_strided_slice %351 {offsets = [0, 64], sizes = [2, 32], strides = [1, 1]} : vector<2x128xf32> to vector<2x32xf32>
    %365 = math.tanh %364 : vector<2x32xf32>
    %366 = vector.extract_strided_slice %351 {offsets = [0, 96], sizes = [2, 32], strides = [1, 1]} : vector<2x128xf32> to vector<2x32xf32>
    %367 = arith.negf %366 : vector<2x32xf32>
    %368 = math.exp %367 : vector<2x32xf32>
    %cst_108 = arith.constant 1.000000e+00 : f32
    %369 = vector.broadcast %cst_108 : f32 to vector<2x32xf32>
    %370 = arith.addf %369, %368 : vector<2x32xf32>
    %371 = arith.divf %369, %370 : vector<2x32xf32>
    %372 = arith.mulf %363, %323 : vector<2x32xf32>
    %373 = arith.mulf %357, %365 : vector<2x32xf32>
    %374 = arith.addf %372, %373 : vector<2x32xf32>
    %375 = math.tanh %374 : vector<2x32xf32>
    %376 = arith.mulf %371, %375 : vector<2x32xf32>
    %377 = arith.index_cast %347 : i32 to index
    %c0_109 = arith.constant 0 : index
    %378 = vector.load %arg9[%377, %c0_109] : memref<16x32xf32, #tpu.memory_space<vmem>>, vector<2x32xf32>
    tpu.vector_store %arg9[%377, %c0_109], %376 {strides = array<i32>} : memref<16x32xf32, #tpu.memory_space<vmem>>, vector<2x32xf32>,
    %379 = vector.broadcast %0 : vector<1x32xf32> to vector<2x32xf32>
    %380 = arith.mulf %376, %379 : vector<2x32xf32>
    %cst_110 = arith.constant dense<0.000000e+00> : vector<2xf32>
    %381 = vector.multi_reduction <add>, %380, %cst_110 [1] : vector<2x32xf32> to vector<2xf32>
    %382 = vector.shape_cast %381 : vector<2xf32> to vector<2x1xf32>
    %383 = vector.broadcast %1 : vector<1x1xf32> to vector<2x1xf32>
    %384 = arith.addf %382, %383 : vector<2x1xf32>
    %385 = arith.maximumf %334, %384 : vector<2x1xf32>
    %386 = arith.subf %334, %385 : vector<2x1xf32>
    %387 = math.exp %386 : vector<2x1xf32>
    %388 = arith.subf %384, %385 : vector<2x1xf32>
    %389 = math.exp %388 : vector<2x1xf32>
    %390 = arith.mulf %387, %340 : vector<2x1xf32>
    %391 = arith.addf %390, %389 : vector<2x1xf32>
    %392 = vector.broadcast %387 : vector<2x1xf32> to vector<2x32xf32>
    %393 = arith.mulf %392, %345 : vector<2x32xf32>
    %394 = vector.broadcast %389 : vector<2x1xf32> to vector<2x32xf32>
    %395 = arith.mulf %394, %376 : vector<2x32xf32>
    %396 = arith.addf %393, %395 : vector<2x32xf32>
    %c2_i32_111 = arith.constant 2 : i32
    %c2_i32_112 = arith.constant 2 : i32
    %397 = arith.muli %c2_i32_111, %c2_i32_112 : i32
    %398 = tpu.assume_multiple %397, 2 : i32
    %399 = arith.index_cast %398 : i32 to index
    %c0_113 = arith.constant 0 : index
    %400 = vector.load %arg13[%399, %c0_113] : memref<16x128xf32, #tpu.memory_space<vmem>>, vector<2x128xf32>
    %cst_114 = arith.constant dense<0.000000e+00> : vector<2x128xf32>
    %401 = tpu.matmul %376, %289, %cst_114 {dimension_numbers = #tpu.dot_dimension_numbers<[1], [0], [0], [1], [0, 0, 1, 1], [], []>} : vector<2x32xf32>, vector<32x128xf32>, vector<2x128xf32> -> vector<2x128xf32>
    %402 = arith.addf %400, %401 : vector<2x128xf32>
    %403 = vector.extract_strided_slice %402 {offsets = [0, 0], sizes = [2, 32], strides = [1, 1]} : vector<2x128xf32> to vector<2x32xf32>
    %404 = arith.negf %403 : vector<2x32xf32>
    %405 = math.exp %404 : vector<2x32xf32>
    %cst_115 = arith.constant 1.000000e+00 : f32
    %406 = vector.broadcast %cst_115 : f32 to vector<2x32xf32>
    %407 = arith.addf %406, %405 : vector<2x32xf32>
    %408 = arith.divf %406, %407 : vector<2x32xf32>
    %409 = vector.extract_strided_slice %402 {offsets = [0, 32], sizes = [2, 32], strides = [1, 1]} : vector<2x128xf32> to vector<2x32xf32>
    %410 = arith.negf %409 : vector<2x32xf32>
    %411 = math.exp %410 : vector<2x32xf32>
    %cst_116 = arith.constant 1.000000e+00 : f32
    %412 = vector.broadcast %cst_116 : f32 to vector<2x32xf32>
    %413 = arith.addf %412, %411 : vector<2x32xf32>
    %414 = arith.divf %412, %413 : vector<2x32xf32>
    %415 = vector.extract_strided_slice %402 {offsets = [0, 64], sizes = [2, 32], strides = [1, 1]} : vector<2x128xf32> to vector<2x32xf32>
    %416 = math.tanh %415 : vector<2x32xf32>
    %417 = vector.extract_strided_slice %402 {offsets = [0, 96], sizes = [2, 32], strides = [1, 1]} : vector<2x128xf32> to vector<2x32xf32>
    %418 = arith.negf %417 : vector<2x32xf32>
    %419 = math.exp %418 : vector<2x32xf32>
    %cst_117 = arith.constant 1.000000e+00 : f32
    %420 = vector.broadcast %cst_117 : f32 to vector<2x32xf32>
    %421 = arith.addf %420, %419 : vector<2x32xf32>
    %422 = arith.divf %420, %421 : vector<2x32xf32>
    %423 = arith.mulf %414, %374 : vector<2x32xf32>
    %424 = arith.mulf %408, %416 : vector<2x32xf32>
    %425 = arith.addf %423, %424 : vector<2x32xf32>
    %426 = math.tanh %425 : vector<2x32xf32>
    %427 = arith.mulf %422, %426 : vector<2x32xf32>
    %428 = arith.index_cast %398 : i32 to index
    %c0_118 = arith.constant 0 : index
    %429 = vector.load %arg9[%428, %c0_118] : memref<16x32xf32, #tpu.memory_space<vmem>>, vector<2x32xf32>
    tpu.vector_store %arg9[%428, %c0_118], %427 {strides = array<i32>} : memref<16x32xf32, #tpu.memory_space<vmem>>, vector<2x32xf32>,
    %430 = vector.broadcast %0 : vector<1x32xf32> to vector<2x32xf32>
    %431 = arith.mulf %427, %430 : vector<2x32xf32>
    %cst_119 = arith.constant dense<0.000000e+00> : vector<2xf32>
    %432 = vector.multi_reduction <add>, %431, %cst_119 [1] : vector<2x32xf32> to vector<2xf32>
    %433 = vector.shape_cast %432 : vector<2xf32> to vector<2x1xf32>
    %434 = vector.broadcast %1 : vector<1x1xf32> to vector<2x1xf32>
    %435 = arith.addf %433, %434 : vector<2x1xf32>
    %436 = arith.maximumf %385, %435 : vector<2x1xf32>
    %437 = arith.subf %385, %436 : vector<2x1xf32>
    %438 = math.exp %437 : vector<2x1xf32>
    %439 = arith.subf %435, %436 : vector<2x1xf32>
    %440 = math.exp %439 : vector<2x1xf32>
    %441 = arith.mulf %438, %391 : vector<2x1xf32>
    %442 = arith.addf %441, %440 : vector<2x1xf32>
    %443 = vector.broadcast %438 : vector<2x1xf32> to vector<2x32xf32>
    %444 = arith.mulf %443, %396 : vector<2x32xf32>
    %445 = vector.broadcast %440 : vector<2x1xf32> to vector<2x32xf32>
    %446 = arith.mulf %445, %427 : vector<2x32xf32>
    %447 = arith.addf %444, %446 : vector<2x32xf32>
    %c3_i32_120 = arith.constant 3 : i32
    %c2_i32_121 = arith.constant 2 : i32
    %448 = arith.muli %c3_i32_120, %c2_i32_121 : i32
    %449 = tpu.assume_multiple %448, 2 : i32
    %450 = arith.index_cast %449 : i32 to index
    %c0_122 = arith.constant 0 : index
    %451 = vector.load %arg13[%450, %c0_122] : memref<16x128xf32, #tpu.memory_space<vmem>>, vector<2x128xf32>
    %cst_123 = arith.constant dense<0.000000e+00> : vector<2x128xf32>
    %452 = tpu.matmul %427, %289, %cst_123 {dimension_numbers = #tpu.dot_dimension_numbers<[1], [0], [0], [1], [0, 0, 1, 1], [], []>} : vector<2x32xf32>, vector<32x128xf32>, vector<2x128xf32> -> vector<2x128xf32>
    %453 = arith.addf %451, %452 : vector<2x128xf32>
    %454 = vector.extract_strided_slice %453 {offsets = [0, 0], sizes = [2, 32], strides = [1, 1]} : vector<2x128xf32> to vector<2x32xf32>
    %455 = arith.negf %454 : vector<2x32xf32>
    %456 = math.exp %455 : vector<2x32xf32>
    %cst_124 = arith.constant 1.000000e+00 : f32
    %457 = vector.broadcast %cst_124 : f32 to vector<2x32xf32>
    %458 = arith.addf %457, %456 : vector<2x32xf32>
    %459 = arith.divf %457, %458 : vector<2x32xf32>
    %460 = vector.extract_strided_slice %453 {offsets = [0, 32], sizes = [2, 32], strides = [1, 1]} : vector<2x128xf32> to vector<2x32xf32>
    %461 = arith.negf %460 : vector<2x32xf32>
    %462 = math.exp %461 : vector<2x32xf32>
    %cst_125 = arith.constant 1.000000e+00 : f32
    %463 = vector.broadcast %cst_125 : f32 to vector<2x32xf32>
    %464 = arith.addf %463, %462 : vector<2x32xf32>
    %465 = arith.divf %463, %464 : vector<2x32xf32>
    %466 = vector.extract_strided_slice %453 {offsets = [0, 64], sizes = [2, 32], strides = [1, 1]} : vector<2x128xf32> to vector<2x32xf32>
    %467 = math.tanh %466 : vector<2x32xf32>
    %468 = vector.extract_strided_slice %453 {offsets = [0, 96], sizes = [2, 32], strides = [1, 1]} : vector<2x128xf32> to vector<2x32xf32>
    %469 = arith.negf %468 : vector<2x32xf32>
    %470 = math.exp %469 : vector<2x32xf32>
    %cst_126 = arith.constant 1.000000e+00 : f32
    %471 = vector.broadcast %cst_126 : f32 to vector<2x32xf32>
    %472 = arith.addf %471, %470 : vector<2x32xf32>
    %473 = arith.divf %471, %472 : vector<2x32xf32>
    %474 = arith.mulf %465, %425 : vector<2x32xf32>
    %475 = arith.mulf %459, %467 : vector<2x32xf32>
    %476 = arith.addf %474, %475 : vector<2x32xf32>
    %477 = math.tanh %476 : vector<2x32xf32>
    %478 = arith.mulf %473, %477 : vector<2x32xf32>
    %479 = arith.index_cast %449 : i32 to index
    %c0_127 = arith.constant 0 : index
    %480 = vector.load %arg9[%479, %c0_127] : memref<16x32xf32, #tpu.memory_space<vmem>>, vector<2x32xf32>
    tpu.vector_store %arg9[%479, %c0_127], %478 {strides = array<i32>} : memref<16x32xf32, #tpu.memory_space<vmem>>, vector<2x32xf32>,
    %481 = vector.broadcast %0 : vector<1x32xf32> to vector<2x32xf32>
    %482 = arith.mulf %478, %481 : vector<2x32xf32>
    %cst_128 = arith.constant dense<0.000000e+00> : vector<2xf32>
    %483 = vector.multi_reduction <add>, %482, %cst_128 [1] : vector<2x32xf32> to vector<2xf32>
    %484 = vector.shape_cast %483 : vector<2xf32> to vector<2x1xf32>
    %485 = vector.broadcast %1 : vector<1x1xf32> to vector<2x1xf32>
    %486 = arith.addf %484, %485 : vector<2x1xf32>
    %487 = arith.maximumf %436, %486 : vector<2x1xf32>
    %488 = arith.subf %436, %487 : vector<2x1xf32>
    %489 = math.exp %488 : vector<2x1xf32>
    %490 = arith.subf %486, %487 : vector<2x1xf32>
    %491 = math.exp %490 : vector<2x1xf32>
    %492 = arith.mulf %489, %442 : vector<2x1xf32>
    %493 = arith.addf %492, %491 : vector<2x1xf32>
    %494 = vector.broadcast %489 : vector<2x1xf32> to vector<2x32xf32>
    %495 = arith.mulf %494, %447 : vector<2x32xf32>
    %496 = vector.broadcast %491 : vector<2x1xf32> to vector<2x32xf32>
    %497 = arith.mulf %496, %478 : vector<2x32xf32>
    %498 = arith.addf %495, %497 : vector<2x32xf32>
    %c4_i32_129 = arith.constant 4 : i32
    %c2_i32_130 = arith.constant 2 : i32
    %499 = arith.muli %c4_i32_129, %c2_i32_130 : i32
    %500 = tpu.assume_multiple %499, 2 : i32
    %501 = arith.index_cast %500 : i32 to index
    %c0_131 = arith.constant 0 : index
    %502 = vector.load %arg13[%501, %c0_131] : memref<16x128xf32, #tpu.memory_space<vmem>>, vector<2x128xf32>
    %cst_132 = arith.constant dense<0.000000e+00> : vector<2x128xf32>
    %503 = tpu.matmul %478, %289, %cst_132 {dimension_numbers = #tpu.dot_dimension_numbers<[1], [0], [0], [1], [0, 0, 1, 1], [], []>} : vector<2x32xf32>, vector<32x128xf32>, vector<2x128xf32> -> vector<2x128xf32>
    %504 = arith.addf %502, %503 : vector<2x128xf32>
    %505 = vector.extract_strided_slice %504 {offsets = [0, 0], sizes = [2, 32], strides = [1, 1]} : vector<2x128xf32> to vector<2x32xf32>
    %506 = arith.negf %505 : vector<2x32xf32>
    %507 = math.exp %506 : vector<2x32xf32>
    %cst_133 = arith.constant 1.000000e+00 : f32
    %508 = vector.broadcast %cst_133 : f32 to vector<2x32xf32>
    %509 = arith.addf %508, %507 : vector<2x32xf32>
    %510 = arith.divf %508, %509 : vector<2x32xf32>
    %511 = vector.extract_strided_slice %504 {offsets = [0, 32], sizes = [2, 32], strides = [1, 1]} : vector<2x128xf32> to vector<2x32xf32>
    %512 = arith.negf %511 : vector<2x32xf32>
    %513 = math.exp %512 : vector<2x32xf32>
    %cst_134 = arith.constant 1.000000e+00 : f32
    %514 = vector.broadcast %cst_134 : f32 to vector<2x32xf32>
    %515 = arith.addf %514, %513 : vector<2x32xf32>
    %516 = arith.divf %514, %515 : vector<2x32xf32>
    %517 = vector.extract_strided_slice %504 {offsets = [0, 64], sizes = [2, 32], strides = [1, 1]} : vector<2x128xf32> to vector<2x32xf32>
    %518 = math.tanh %517 : vector<2x32xf32>
    %519 = vector.extract_strided_slice %504 {offsets = [0, 96], sizes = [2, 32], strides = [1, 1]} : vector<2x128xf32> to vector<2x32xf32>
    %520 = arith.negf %519 : vector<2x32xf32>
    %521 = math.exp %520 : vector<2x32xf32>
    %cst_135 = arith.constant 1.000000e+00 : f32
    %522 = vector.broadcast %cst_135 : f32 to vector<2x32xf32>
    %523 = arith.addf %522, %521 : vector<2x32xf32>
    %524 = arith.divf %522, %523 : vector<2x32xf32>
    %525 = arith.mulf %516, %476 : vector<2x32xf32>
    %526 = arith.mulf %510, %518 : vector<2x32xf32>
    %527 = arith.addf %525, %526 : vector<2x32xf32>
    %528 = math.tanh %527 : vector<2x32xf32>
    %529 = arith.mulf %524, %528 : vector<2x32xf32>
    %530 = arith.index_cast %500 : i32 to index
    %c0_136 = arith.constant 0 : index
    %531 = vector.load %arg9[%530, %c0_136] : memref<16x32xf32, #tpu.memory_space<vmem>>, vector<2x32xf32>
    tpu.vector_store %arg9[%530, %c0_136], %529 {strides = array<i32>} : memref<16x32xf32, #tpu.memory_space<vmem>>, vector<2x32xf32>,
    %532 = vector.broadcast %0 : vector<1x32xf32> to vector<2x32xf32>
    %533 = arith.mulf %529, %532 : vector<2x32xf32>
    %cst_137 = arith.constant dense<0.000000e+00> : vector<2xf32>
    %534 = vector.multi_reduction <add>, %533, %cst_137 [1] : vector<2x32xf32> to vector<2xf32>
    %535 = vector.shape_cast %534 : vector<2xf32> to vector<2x1xf32>
    %536 = vector.broadcast %1 : vector<1x1xf32> to vector<2x1xf32>
    %537 = arith.addf %535, %536 : vector<2x1xf32>
    %538 = arith.maximumf %487, %537 : vector<2x1xf32>
    %539 = arith.subf %487, %538 : vector<2x1xf32>
    %540 = math.exp %539 : vector<2x1xf32>
    %541 = arith.subf %537, %538 : vector<2x1xf32>
    %542 = math.exp %541 : vector<2x1xf32>
    %543 = arith.mulf %540, %493 : vector<2x1xf32>
    %544 = arith.addf %543, %542 : vector<2x1xf32>
    %545 = vector.broadcast %540 : vector<2x1xf32> to vector<2x32xf32>
    %546 = arith.mulf %545, %498 : vector<2x32xf32>
    %547 = vector.broadcast %542 : vector<2x1xf32> to vector<2x32xf32>
    %548 = arith.mulf %547, %529 : vector<2x32xf32>
    %549 = arith.addf %546, %548 : vector<2x32xf32>
    %c5_i32_138 = arith.constant 5 : i32
    %c2_i32_139 = arith.constant 2 : i32
    %550 = arith.muli %c5_i32_138, %c2_i32_139 : i32
    %551 = tpu.assume_multiple %550, 2 : i32
    %552 = arith.index_cast %551 : i32 to index
    %c0_140 = arith.constant 0 : index
    %553 = vector.load %arg13[%552, %c0_140] : memref<16x128xf32, #tpu.memory_space<vmem>>, vector<2x128xf32>
    %cst_141 = arith.constant dense<0.000000e+00> : vector<2x128xf32>
    %554 = tpu.matmul %529, %289, %cst_141 {dimension_numbers = #tpu.dot_dimension_numbers<[1], [0], [0], [1], [0, 0, 1, 1], [], []>} : vector<2x32xf32>, vector<32x128xf32>, vector<2x128xf32> -> vector<2x128xf32>
    %555 = arith.addf %553, %554 : vector<2x128xf32>
    %556 = vector.extract_strided_slice %555 {offsets = [0, 0], sizes = [2, 32], strides = [1, 1]} : vector<2x128xf32> to vector<2x32xf32>
    %557 = arith.negf %556 : vector<2x32xf32>
    %558 = math.exp %557 : vector<2x32xf32>
    %cst_142 = arith.constant 1.000000e+00 : f32
    %559 = vector.broadcast %cst_142 : f32 to vector<2x32xf32>
    %560 = arith.addf %559, %558 : vector<2x32xf32>
    %561 = arith.divf %559, %560 : vector<2x32xf32>
    %562 = vector.extract_strided_slice %555 {offsets = [0, 32], sizes = [2, 32], strides = [1, 1]} : vector<2x128xf32> to vector<2x32xf32>
    %563 = arith.negf %562 : vector<2x32xf32>
    %564 = math.exp %563 : vector<2x32xf32>
    %cst_143 = arith.constant 1.000000e+00 : f32
    %565 = vector.broadcast %cst_143 : f32 to vector<2x32xf32>
    %566 = arith.addf %565, %564 : vector<2x32xf32>
    %567 = arith.divf %565, %566 : vector<2x32xf32>
    %568 = vector.extract_strided_slice %555 {offsets = [0, 64], sizes = [2, 32], strides = [1, 1]} : vector<2x128xf32> to vector<2x32xf32>
    %569 = math.tanh %568 : vector<2x32xf32>
    %570 = vector.extract_strided_slice %555 {offsets = [0, 96], sizes = [2, 32], strides = [1, 1]} : vector<2x128xf32> to vector<2x32xf32>
    %571 = arith.negf %570 : vector<2x32xf32>
    %572 = math.exp %571 : vector<2x32xf32>
    %cst_144 = arith.constant 1.000000e+00 : f32
    %573 = vector.broadcast %cst_144 : f32 to vector<2x32xf32>
    %574 = arith.addf %573, %572 : vector<2x32xf32>
    %575 = arith.divf %573, %574 : vector<2x32xf32>
    %576 = arith.mulf %567, %527 : vector<2x32xf32>
    %577 = arith.mulf %561, %569 : vector<2x32xf32>
    %578 = arith.addf %576, %577 : vector<2x32xf32>
    %579 = math.tanh %578 : vector<2x32xf32>
    %580 = arith.mulf %575, %579 : vector<2x32xf32>
    %581 = arith.index_cast %551 : i32 to index
    %c0_145 = arith.constant 0 : index
    %582 = vector.load %arg9[%581, %c0_145] : memref<16x32xf32, #tpu.memory_space<vmem>>, vector<2x32xf32>
    tpu.vector_store %arg9[%581, %c0_145], %580 {strides = array<i32>} : memref<16x32xf32, #tpu.memory_space<vmem>>, vector<2x32xf32>,
    %583 = vector.broadcast %0 : vector<1x32xf32> to vector<2x32xf32>
    %584 = arith.mulf %580, %583 : vector<2x32xf32>
    %cst_146 = arith.constant dense<0.000000e+00> : vector<2xf32>
    %585 = vector.multi_reduction <add>, %584, %cst_146 [1] : vector<2x32xf32> to vector<2xf32>
    %586 = vector.shape_cast %585 : vector<2xf32> to vector<2x1xf32>
    %587 = vector.broadcast %1 : vector<1x1xf32> to vector<2x1xf32>
    %588 = arith.addf %586, %587 : vector<2x1xf32>
    %589 = arith.maximumf %538, %588 : vector<2x1xf32>
    %590 = arith.subf %538, %589 : vector<2x1xf32>
    %591 = math.exp %590 : vector<2x1xf32>
    %592 = arith.subf %588, %589 : vector<2x1xf32>
    %593 = math.exp %592 : vector<2x1xf32>
    %594 = arith.mulf %591, %544 : vector<2x1xf32>
    %595 = arith.addf %594, %593 : vector<2x1xf32>
    %596 = vector.broadcast %591 : vector<2x1xf32> to vector<2x32xf32>
    %597 = arith.mulf %596, %549 : vector<2x32xf32>
    %598 = vector.broadcast %593 : vector<2x1xf32> to vector<2x32xf32>
    %599 = arith.mulf %598, %580 : vector<2x32xf32>
    %600 = arith.addf %597, %599 : vector<2x32xf32>
    %c6_i32_147 = arith.constant 6 : i32
    %c2_i32_148 = arith.constant 2 : i32
    %601 = arith.muli %c6_i32_147, %c2_i32_148 : i32
    %602 = tpu.assume_multiple %601, 2 : i32
    %603 = arith.index_cast %602 : i32 to index
    %c0_149 = arith.constant 0 : index
    %604 = vector.load %arg13[%603, %c0_149] : memref<16x128xf32, #tpu.memory_space<vmem>>, vector<2x128xf32>
    %cst_150 = arith.constant dense<0.000000e+00> : vector<2x128xf32>
    %605 = tpu.matmul %580, %289, %cst_150 {dimension_numbers = #tpu.dot_dimension_numbers<[1], [0], [0], [1], [0, 0, 1, 1], [], []>} : vector<2x32xf32>, vector<32x128xf32>, vector<2x128xf32> -> vector<2x128xf32>
    %606 = arith.addf %604, %605 : vector<2x128xf32>
    %607 = vector.extract_strided_slice %606 {offsets = [0, 0], sizes = [2, 32], strides = [1, 1]} : vector<2x128xf32> to vector<2x32xf32>
    %608 = arith.negf %607 : vector<2x32xf32>
    %609 = math.exp %608 : vector<2x32xf32>
    %cst_151 = arith.constant 1.000000e+00 : f32
    %610 = vector.broadcast %cst_151 : f32 to vector<2x32xf32>
    %611 = arith.addf %610, %609 : vector<2x32xf32>
    %612 = arith.divf %610, %611 : vector<2x32xf32>
    %613 = vector.extract_strided_slice %606 {offsets = [0, 32], sizes = [2, 32], strides = [1, 1]} : vector<2x128xf32> to vector<2x32xf32>
    %614 = arith.negf %613 : vector<2x32xf32>
    %615 = math.exp %614 : vector<2x32xf32>
    %cst_152 = arith.constant 1.000000e+00 : f32
    %616 = vector.broadcast %cst_152 : f32 to vector<2x32xf32>
    %617 = arith.addf %616, %615 : vector<2x32xf32>
    %618 = arith.divf %616, %617 : vector<2x32xf32>
    %619 = vector.extract_strided_slice %606 {offsets = [0, 64], sizes = [2, 32], strides = [1, 1]} : vector<2x128xf32> to vector<2x32xf32>
    %620 = math.tanh %619 : vector<2x32xf32>
    %621 = vector.extract_strided_slice %606 {offsets = [0, 96], sizes = [2, 32], strides = [1, 1]} : vector<2x128xf32> to vector<2x32xf32>
    %622 = arith.negf %621 : vector<2x32xf32>
    %623 = math.exp %622 : vector<2x32xf32>
    %cst_153 = arith.constant 1.000000e+00 : f32
    %624 = vector.broadcast %cst_153 : f32 to vector<2x32xf32>
    %625 = arith.addf %624, %623 : vector<2x32xf32>
    %626 = arith.divf %624, %625 : vector<2x32xf32>
    %627 = arith.mulf %618, %578 : vector<2x32xf32>
    %628 = arith.mulf %612, %620 : vector<2x32xf32>
    %629 = arith.addf %627, %628 : vector<2x32xf32>
    %630 = math.tanh %629 : vector<2x32xf32>
    %631 = arith.mulf %626, %630 : vector<2x32xf32>
    %632 = arith.index_cast %602 : i32 to index
    %c0_154 = arith.constant 0 : index
    %633 = vector.load %arg9[%632, %c0_154] : memref<16x32xf32, #tpu.memory_space<vmem>>, vector<2x32xf32>
    tpu.vector_store %arg9[%632, %c0_154], %631 {strides = array<i32>} : memref<16x32xf32, #tpu.memory_space<vmem>>, vector<2x32xf32>,
    %634 = vector.broadcast %0 : vector<1x32xf32> to vector<2x32xf32>
    %635 = arith.mulf %631, %634 : vector<2x32xf32>
    %cst_155 = arith.constant dense<0.000000e+00> : vector<2xf32>
    %636 = vector.multi_reduction <add>, %635, %cst_155 [1] : vector<2x32xf32> to vector<2xf32>
    %637 = vector.shape_cast %636 : vector<2xf32> to vector<2x1xf32>
    %638 = vector.broadcast %1 : vector<1x1xf32> to vector<2x1xf32>
    %639 = arith.addf %637, %638 : vector<2x1xf32>
    %640 = arith.maximumf %589, %639 : vector<2x1xf32>
    %641 = arith.subf %589, %640 : vector<2x1xf32>
    %642 = math.exp %641 : vector<2x1xf32>
    %643 = arith.subf %639, %640 : vector<2x1xf32>
    %644 = math.exp %643 : vector<2x1xf32>
    %645 = arith.mulf %642, %595 : vector<2x1xf32>
    %646 = arith.addf %645, %644 : vector<2x1xf32>
    %647 = vector.broadcast %642 : vector<2x1xf32> to vector<2x32xf32>
    %648 = arith.mulf %647, %600 : vector<2x32xf32>
    %649 = vector.broadcast %644 : vector<2x1xf32> to vector<2x32xf32>
    %650 = arith.mulf %649, %631 : vector<2x32xf32>
    %651 = arith.addf %648, %650 : vector<2x32xf32>
    %c7_i32_156 = arith.constant 7 : i32
    %c2_i32_157 = arith.constant 2 : i32
    %652 = arith.muli %c7_i32_156, %c2_i32_157 : i32
    %653 = tpu.assume_multiple %652, 2 : i32
    %654 = arith.index_cast %653 : i32 to index
    %c0_158 = arith.constant 0 : index
    %655 = vector.load %arg13[%654, %c0_158] : memref<16x128xf32, #tpu.memory_space<vmem>>, vector<2x128xf32>
    %cst_159 = arith.constant dense<0.000000e+00> : vector<2x128xf32>
    %656 = tpu.matmul %631, %289, %cst_159 {dimension_numbers = #tpu.dot_dimension_numbers<[1], [0], [0], [1], [0, 0, 1, 1], [], []>} : vector<2x32xf32>, vector<32x128xf32>, vector<2x128xf32> -> vector<2x128xf32>
    %657 = arith.addf %655, %656 : vector<2x128xf32>
    %658 = vector.extract_strided_slice %657 {offsets = [0, 0], sizes = [2, 32], strides = [1, 1]} : vector<2x128xf32> to vector<2x32xf32>
    %659 = arith.negf %658 : vector<2x32xf32>
    %660 = math.exp %659 : vector<2x32xf32>
    %cst_160 = arith.constant 1.000000e+00 : f32
    %661 = vector.broadcast %cst_160 : f32 to vector<2x32xf32>
    %662 = arith.addf %661, %660 : vector<2x32xf32>
    %663 = arith.divf %661, %662 : vector<2x32xf32>
    %664 = vector.extract_strided_slice %657 {offsets = [0, 32], sizes = [2, 32], strides = [1, 1]} : vector<2x128xf32> to vector<2x32xf32>
    %665 = arith.negf %664 : vector<2x32xf32>
    %666 = math.exp %665 : vector<2x32xf32>
    %cst_161 = arith.constant 1.000000e+00 : f32
    %667 = vector.broadcast %cst_161 : f32 to vector<2x32xf32>
    %668 = arith.addf %667, %666 : vector<2x32xf32>
    %669 = arith.divf %667, %668 : vector<2x32xf32>
    %670 = vector.extract_strided_slice %657 {offsets = [0, 64], sizes = [2, 32], strides = [1, 1]} : vector<2x128xf32> to vector<2x32xf32>
    %671 = math.tanh %670 : vector<2x32xf32>
    %672 = vector.extract_strided_slice %657 {offsets = [0, 96], sizes = [2, 32], strides = [1, 1]} : vector<2x128xf32> to vector<2x32xf32>
    %673 = arith.negf %672 : vector<2x32xf32>
    %674 = math.exp %673 : vector<2x32xf32>
    %cst_162 = arith.constant 1.000000e+00 : f32
    %675 = vector.broadcast %cst_162 : f32 to vector<2x32xf32>
    %676 = arith.addf %675, %674 : vector<2x32xf32>
    %677 = arith.divf %675, %676 : vector<2x32xf32>
    %678 = arith.mulf %669, %629 : vector<2x32xf32>
    %679 = arith.mulf %663, %671 : vector<2x32xf32>
    %680 = arith.addf %678, %679 : vector<2x32xf32>
    %681 = math.tanh %680 : vector<2x32xf32>
    %682 = arith.mulf %677, %681 : vector<2x32xf32>
    %683 = arith.index_cast %653 : i32 to index
    %c0_163 = arith.constant 0 : index
    %684 = vector.load %arg9[%683, %c0_163] : memref<16x32xf32, #tpu.memory_space<vmem>>, vector<2x32xf32>
    tpu.vector_store %arg9[%683, %c0_163], %682 {strides = array<i32>} : memref<16x32xf32, #tpu.memory_space<vmem>>, vector<2x32xf32>,
    %685 = vector.broadcast %0 : vector<1x32xf32> to vector<2x32xf32>
    %686 = arith.mulf %682, %685 : vector<2x32xf32>
    %cst_164 = arith.constant dense<0.000000e+00> : vector<2xf32>
    %687 = vector.multi_reduction <add>, %686, %cst_164 [1] : vector<2x32xf32> to vector<2xf32>
    %688 = vector.shape_cast %687 : vector<2xf32> to vector<2x1xf32>
    %689 = vector.broadcast %1 : vector<1x1xf32> to vector<2x1xf32>
    %690 = arith.addf %688, %689 : vector<2x1xf32>
    %691 = arith.maximumf %640, %690 : vector<2x1xf32>
    %692 = arith.subf %640, %691 : vector<2x1xf32>
    %693 = math.exp %692 : vector<2x1xf32>
    %694 = arith.subf %690, %691 : vector<2x1xf32>
    %695 = math.exp %694 : vector<2x1xf32>
    %696 = arith.mulf %693, %646 : vector<2x1xf32>
    %697 = arith.addf %696, %695 : vector<2x1xf32>
    %698 = vector.broadcast %693 : vector<2x1xf32> to vector<2x32xf32>
    %699 = arith.mulf %698, %651 : vector<2x32xf32>
    %700 = vector.broadcast %695 : vector<2x1xf32> to vector<2x32xf32>
    %701 = arith.mulf %700, %682 : vector<2x32xf32>
    %702 = arith.addf %699, %701 : vector<2x32xf32>
    %c8_i32_165 = arith.constant 8 : i32
    %703 = vector.broadcast %697 : vector<2x1xf32> to vector<2x32xf32>
    %704 = arith.divf %702, %703 : vector<2x32xf32>
    %c0_166 = arith.constant 0 : index
    %c0_167 = arith.constant 0 : index
    %705 = vector.load %arg10[%c0_166, %c0_167] : memref<2x32xf32, #tpu.memory_space<vmem>>, vector<2x32xf32>
    tpu.vector_store %arg10[%c0_166, %c0_167], %704 {strides = array<i32>} : memref<2x32xf32, #tpu.memory_space<vmem>>, vector<2x32xf32>,
    %c1 = arith.constant 1 : index
    %c0_168 = arith.constant 0 : index
    %c0_169 = arith.constant 0 : index
    %706 = vector.load %arg11[%c1, %c0_168, %c0_169] : memref<2x2x32xf32, #tpu.memory_space<vmem>>, vector<1x2x32xf32>
    %707 = vector.shape_cast %706 : vector<1x2x32xf32> to vector<2x32xf32>
    %708 = vector.shape_cast %682 : vector<2x32xf32> to vector<1x2x32xf32>
    tpu.vector_store %arg11[%c1, %c0_168, %c0_169], %708 {strides = array<i32>} : memref<2x2x32xf32, #tpu.memory_space<vmem>>, vector<1x2x32xf32>,
    %c1_170 = arith.constant 1 : index
    %c0_171 = arith.constant 0 : index
    %c0_172 = arith.constant 0 : index
    %709 = vector.load %arg12[%c1_170, %c0_171, %c0_172] : memref<2x2x32xf32, #tpu.memory_space<vmem>>, vector<1x2x32xf32>
    %710 = vector.shape_cast %709 : vector<1x2x32xf32> to vector<2x32xf32>
    %711 = vector.shape_cast %680 : vector<2x32xf32> to vector<1x2x32xf32>
    tpu.vector_store %arg12[%c1_170, %c0_171, %c0_172], %711 {strides = array<i32>} : memref<2x2x32xf32, #tpu.memory_space<vmem>>, vector<1x2x32xf32>,
    return
  }
}

module attributes {stable_mosaic.version = 11 : i64} {
  func.func @_fc_kernel(%arg0: i32, %arg1: memref<16x64xf32, #tpu.memory_space<vmem>>, %arg2: memref<64x128xf32, #tpu.memory_space<vmem>>, %arg3: memref<1x128xf32, #tpu.memory_space<vmem>>, %arg4: memref<16x128xf32, #tpu.memory_space<vmem>>) attributes {dimension_semantics = [#tpu.dimension_semantics<parallel>], iteration_bounds = array<i64: 1>, scalar_prefetch = 0 : i64, scratch_operands = 0 : i64, tpu.core_type = #tpu.core_type<tc>, window_params = [{pipeline_mode = #tpu.pipeline_mode<synchronous>, transform_indices = @transform_0, window_bounds = array<i64: 16, 64>}, {transform_indices = @transform_1, window_bounds = array<i64: 64, 128>}, {transform_indices = @transform_2, window_bounds = array<i64: 1, 128>}, {transform_indices = @transform_3, window_bounds = array<i64: 16, 128>}]} {
    %c0 = arith.constant 0 : index
    %c0_0 = arith.constant 0 : index
    %0 = vector.load %arg1[%c0, %c0_0] : memref<16x64xf32, #tpu.memory_space<vmem>>, vector<16x64xf32>
    %c0_1 = arith.constant 0 : index
    %c0_2 = arith.constant 0 : index
    %1 = vector.load %arg2[%c0_1, %c0_2] : memref<64x128xf32, #tpu.memory_space<vmem>>, vector<64x128xf32>
    %cst = arith.constant dense<0.000000e+00> : vector<16x128xf32>
    %2 = tpu.matmul %0, %1, %cst {dimension_numbers = #tpu.dot_dimension_numbers<[1], [0], [0], [1], [0, 0, 1, 1], [], []>} : vector<16x64xf32>, vector<64x128xf32>, vector<16x128xf32> -> vector<16x128xf32>
    %c0_3 = arith.constant 0 : index
    %c0_4 = arith.constant 0 : index
    %3 = vector.load %arg3[%c0_3, %c0_4] : memref<1x128xf32, #tpu.memory_space<vmem>>, vector<1x128xf32>
    %4 = vector.broadcast %3 : vector<1x128xf32> to vector<16x128xf32>
    %5 = arith.addf %2, %4 : vector<16x128xf32>
    %c0_5 = arith.constant 0 : index
    %c0_6 = arith.constant 0 : index
    %6 = vector.load %arg4[%c0_5, %c0_6] : memref<16x128xf32, #tpu.memory_space<vmem>>, vector<16x128xf32>
    tpu.vector_store %arg4[%c0_5, %c0_6], %5 {strides = array<i32>} : memref<16x128xf32, #tpu.memory_space<vmem>>, vector<16x128xf32>,
    return
  }
  func.func @transform_0(%arg0: i32) -> (i32, i32) {
    %c0_i32 = arith.constant 0 : i32
    %c0_i32_0 = arith.constant 0 : i32
    %c0_i32_1 = arith.constant 0 : i32
    return %c0_i32, %c0_i32_0 : i32, i32
  }
  func.func @transform_1(%arg0: i32) -> (i32, i32) {
    %c0_i32 = arith.constant 0 : i32
    %c0_i32_0 = arith.constant 0 : i32
    return %c0_i32, %arg0 : i32, i32
  }
  func.func @transform_2(%arg0: i32) -> (i32, i32) {
    %c0_i32 = arith.constant 0 : i32
    %c0_i32_0 = arith.constant 0 : i32
    return %c0_i32, %arg0 : i32, i32
  }
  func.func @transform_3(%arg0: i32) -> (i32, i32) {
    %c0_i32 = arith.constant 0 : i32
    %c0_i32_0 = arith.constant 0 : i32
    return %c0_i32, %arg0 : i32, i32
  }
}

</mosaic_0001>

<bundles_post_ra>
// kernel: next_word_predictor_forward.3
= control target key start
LH: loop header
LB: loop body
LE: loop exit
PB: predicated region body
PF: predicated region fallthrough
CT: control target
= control target key end

     0   :  { %vm31_vm0 = vcmask 523264   ;;  %s228_s1 = inlined_call_operand.vmem [shape: f32[64,128], index: 1, kind: input, shape index: {}]   ;;  %s229_s0 = inlined_call_operand.vmem [shape: f32[16,64], index: 0, kind: input, shape index: {}]   ;;  %s230_s2 = inlined_call_operand.vmem [shape: f32[1,128], index: 2, kind: input, shape index: {}]   ;;  %s231_s3 = inlined_call_operand.vmem [shape: f32[16,128], index: 3, kind: output, shape index: {}]  }
   0x1   :  { %v16_v0 = vld [vmem:[%s228_s1] sm:$0xff]  ;;  %v17_v1 = vld [vmem:[%s228_s1 + $0x8] sm:$0xff]  ;;  %v18_v2 = vld [vmem:[%s228_s1 + $0x10] sm:$0xff] }
   0x2   :  { %v151_v3 = vpack.c.bf16 %v17_v1, %v16_v0  ;;  %v19_v4 = vld [vmem:[%s228_s1 + $0x18] sm:$0xff]  ;;  %v20_v6 = vld [vmem:[%s228_s1 + $0x20] sm:$0xff]  ;;  %v21_v7 = vld [vmem:[%s228_s1 + $0x28] sm:$0xff] }
   0x3   :  { %v155_v5 = vpack.c.bf16 %v19_v4, %v18_v2  ;;  %v14_v8 = vld [vmem:[%s229_s0] sm:$0xff]  ;;  %v159_v9 = vpack.c.bf16 %v21_v7, %v20_v6  ;;  %v22_v10 = vld [vmem:[%s228_s1 + $0x30] sm:$0xff]  ;;  %v23_v11 = vld [vmem:[%s228_s1 + $0x38] sm:$0xff] }
   0x4   :  { %152 = vmatprep.subr.bf16.mxu0 %v151_v3  ;;  %148 = vmatprep.mubr.msk.f32.mxu0 %vm31_vm0, %v14_v8  ;;  %v163_v12 = vpack.c.bf16 %v23_v11, %v22_v10  ;;  %v15_v13 = vld [vmem:[%s229_s0 + $0x8] sm:$0xff]  ;;  %v119_v14 = vld [vmem:[%s230_s2] ss:$0 sm:$0xff] }
   0x5   :  { %154 = vmatpush3.bf16.msra.mxu0 %v151_v3 }
   0x6   :  { %156 = vmatprep.subr.bf16.mxu0 %v155_v5 }
   0x9   :  { %158 = vmatpush3.bf16.msra.mxu0 %v155_v5 }
   0xa   :  { %160 = vmatprep.subr.bf16.mxu0 %v159_v9 }
   0xd   :  { %162 = vmatpush3.bf16.msra.mxu0 %v159_v9 }
   0xe   :  { %164 = vmatprep.subr.bf16.mxu0 %v163_v12 }
  0x11   :  { %166 = vmatpush3.bf16.msra.mxu0 %v163_v12 }
  0x14   :  { %149 = vmatmul.mubr.msk.f32.vlgmr.msra.gmra.mrb[0].mxu0 %vm31_vm0, %v15_v13 }
  0xe7   :  { %v150_v15 = vpop.f32.mrb[0].mxu0 }
  0xe8   :  { %v110_v16 = vadd.f32 %v150_v15, %v119_v14  ;;  %v104_v17 = vpop.f32.mrb[1].mxu0 }
  0xe9   :  { %v105_v18 = vadd.f32 %v119_v14, %v104_v17 }
  0xea   :  { %114 = vst [vmem:[%s231_s3 + $0x8] sm:$0xff] %v110_v16 }
  0xeb   :  { %113 = vst [vmem:[%s231_s3] sm:$0xff] %v105_v18 }

// kernel: next_word_predictor_forward.2
= control target key start
LH: loop header
LB: loop body
LE: loop exit
PB: predicated region body
PF: predicated region fallthrough
CT: control target
= control target key end

     0   :  { %s3377_s0 = inlined_call_operand.vmem [shape: f32[16,16], index: 0, kind: input, shape index: {}]   ;;  %s3378_s1 = inlined_call_operand.vmem [shape: f32[16,128], index: 1, kind: input, shape index: {}]   ;;  %s3379_s2 = inlined_call_operand.vmem [shape: f32[32,128], index: 2, kind: input, shape index: {}]   ;;  %s3380_s3 = inlined_call_operand.vmem [shape: f32[32,128], index: 3, kind: input, shape index: {}]   ;;  %s3381_s4 = inlined_call_operand.vmem [shape: f32[32,128], index: 4, kind: input, shape index: {}]   ;;  %s3382_s5 = inlined_call_operand.vmem [shape: f32[1,128], index: 5, kind: input, shape index: {}]   ;;  %s3383_s6 = inlined_call_operand.vmem [shape: f32[1,128], index: 6, kind: input, shape index: {}]   ;;  %s3384_s7 = inlined_call_operand.vmem [shape: f32[1,32], index: 7, kind: input, shape index: {}]   ;;  %s3385_s8 = inlined_call_operand.<no memory space> [shape: f32[1,1], index: 8, kind: input, shape index: {}]   ;;  %s3386_s9 = inlined_call_operand.vmem [shape: f32[16,32], index: 9, kind: output, shape index: {0}]   ;;  %s3387_s10 = inlined_call_operand.vmem [shape: f32[2,32], index: 10, kind: output, shape index: {1}]   ;;  %s3388_s11 = inlined_call_operand.hbm [shape: f32[2,2,32], index: 11, kind: output, shape index: {2}]   ;;  %s3389_s12 = inlined_call_operand.hbm [shape: f32[2,2,32], index: 12, kind: output, shape index: {3}]  }
   0x1   :  { %v18_v0 = vstv %s3385_s8 }
   0x2   :  { %19 = vst [vmem:[#allocation4] sm:$0x1] %v18_v0 }
   0x3   :  { %20 = vsyncpa [#allocation6], 0  ;;  %v44_v1 = vld [vmem:[%s3378_s1] sm:$0xff]  ;;  %v45_v2 = vld [vmem:[%s3378_s1 + $0x8] sm:$0xff]  ;;  %vm53_vm0 = vcmask 130048   ;;  %v2897_v5 = vmov 0.0|0.0  }
   0x4   :  { %v42_v3 = vld [vmem:[%s3377_s0] sm:$0xff]  ;;  %v2567_v4 = vpack.c.bf16 %v45_v2, %v44_v1  ;;  %2571 = vmatprep.subr.bf16.mxu1 %v2897_v5  ;;  %v138_v7 = vld [vmem:[%s3380_s3 + $0x8] sm:$0xff]  ;;  %v139_v9 = vld [vmem:[%s3380_s3 + $0x10] sm:$0xff]  ;;  %vm2898_vm1 = vmmov 0   ;;  %v2899_v11 = vmov 0.0  }
   0x5   :  { %2377 = vmatprep.mubr.msk.f32.mxu0 %vm53_vm0, %v42_v3  ;;  %v137_v6 = vld [vmem:[%s3380_s3] sm:$0xff]  ;;  %v140_v10 = vld [vmem:[%s3380_s3 + $0x18] sm:$0xff]  ;;  %2388 = vmatprep.mubr.msk.f32.mxu1 %vm2898_vm1, %v2899_v11 }
   0x6   :  { %v2992_v8 = vpack.c.bf16 %v138_v7, %v137_v6 }
   0x7   :  { %21 = vsyncpa [#allocation8], 0  ;;  %2568 = vmatprep.subr.bf16.mxu0 %v2567_v4  ;;  %v43_v12 = vld [vmem:[%s3377_s0 + $0x8] sm:$0xff]  ;;  %v3006_v13 = vpack.c.bf16 %v140_v10, %v139_v9  ;;  %v2238_v14 = vld [vmem:[%s3382_s5] ss:$0 sm:$0xff]  ;;  %s2900_s19 = smov 64  }
   0x8   :  { %2570 = vmatpush3.bf16.msra.mxu0 %v2567_v4  ;;  %2573 = vmatpush3.bf16.msra.mxu1 %v2992_v8  ;;  %s2901_s5 = smov 32   ;;  %vm245_vm2 = vcmask 254976   ;;  %vm142_vm3 = vcmask 261120   ;;  %s2902_s29 = smov 96  }
   0x9   :  { %2574 = vmatprep.subr.bf16.mxu1 %v2897_v5  ;;  %2577 = vmatprep.subr.bf16.mxu0 %v2897_v5  ;;  %s2904_s30 = smov [#allocation5]   ;;  %s2905_s1 = smov [#allocation7]  }
   0xa   :  { %s2207_s13 = sshll.u32 %s2904_s30, 4  ;;  %s2208_s13 = int_to_ptr.vmem [resolvable:$true] %s2207_s13 }
   0xb   :  { %2378 = vmatmul.mubr.msk.f32.vlgmr.msra.gmra.mrb[0].mxu0 %vm53_vm0, %v43_v12  ;;  %s2849_s14 = scalar_lea.vmem %s2208_s13, 64  ;;  %p2854_p1 = scmp.lt.s32.totalorder %s2208_s13, %s2208_s13 }
   0xc   :  { %2576 = vmatpush3.bf16.msra.mxu1 %v3006_v13  ;;  %2579 = vmatpush3.bf16.msra.mxu0 %v2992_v8  ;;  %p2850_p0 = scmp.ne.s32.totalorder %s2208_s13, %s2849_s14  ;;  %p2855_p2 = scmp.lt.s32.totalorder %s2849_s14, %s2849_s14 }
   0xd   :  { %2580 = vmatprep.subr.bf16.mxu0 %v2897_v5  ;;  %2399 = vmatprep.mubr.msk.f32.mxu0 %vm2898_vm1, %v2899_v11 }
   0xe   :  { %2583 = vmatprep.subr.bf16.mxu1 %v2897_v5  ;;  %p2856_p3 = por %p2855_p2, %p2854_p1 }
   0xf   :  { %2389 = vmatmul.mubr.f32.vlgmr.msra.gmra.mrb[0].mxu1 %v2899_v11 }
  0x10   :  { %2582 = vmatpush3.bf16.msra.mxu0 %v3006_v13  ;;  %2585 = vmatpush3.bf16.msra.mxu1 %v2992_v8  ;;  %p2857_p4 = pnand %p2856_p3, %p2850_p0 }
  0x11   :  { %2586 = vmatprep.subr.bf16.mxu1 %v2897_v5  ;;  %2410 = vmatprep.mubr.msk.f32.mxu1 %vm2898_vm1, %v2899_v11 }
  0x12   :  { %2589 = vmatprep.subr.bf16.mxu0 %v2897_v5 }
  0x14   :  { %2588 = vmatpush3.bf16.msra.mxu1 %v3006_v13 }
  0x15   :  { %2595 = vmatprep.subr.bf16.mxu1 %v2897_v5 }
  0xde   :  { %v2379_v15 = vpop.f32.mrb[0].mxu0 }
  0xdf   :  { %v132_v16 = vadd.f32 %v2379_v15, %v2238_v14  ;;  %v126_v17 = vpop.f32.mrb[1].mxu0 }
  0xe0   :  { %v127_v18 = vadd.f32 %v2238_v14, %v126_v17 }
  0xe1   :  { %136 = vst [vmem:[#allocation2 + $0x8] sm:$0xff] %v132_v16 }
  0xe2   :  { %135 = vst [vmem:[#allocation2] sm:$0xff] %v127_v18  ;;  %v212_v19 = vpop.f32.mrb[0].mxu1 }
  0xe3   :  { %v2390_v20 = vpop.f32.mrb[1].mxu1 }
  0xe9   :  { %v141_v21 = vld [vmem:[#allocation2] sm:$0x3]  ;;  %v248_v37 = vld [vmem:[#allocation2 + $0x2] sm:$0x3]  ;;  %v353_v55 = vld [vmem:[#allocation2 + $0x4] sm:$0x3] }
  0xea   :  { %v216_v22 = vadd.f32 %v212_v19, %v141_v21  ;;  %v458_v12 = vld [vmem:[#allocation2 + $0x6] sm:$0x3] }
  0xec   :  { %2687 = vtanh.f32 %v216_v22  ;;  %v2241_v24 = vmul.f32 -1.442695, %v216_v22 }
  0xee   :  { %2689 = vpow2.f32 %v2241_v24 }
  0xf6   :  { %v2688_v23 = vpop.eup %2687 }
  0xf7   :  { %226 = vrot.lane.b32.xlu0 %v2688_v23, %s2900_s19 }
  0xf8   :  { %v2690_v25 = vpop.eup %2689 }
  0xf9   :  { %v220_v26 = vadd.f32 1.0, %v2690_v25 }
  0xfb   :  { %2691 = vrcp.f32 %v220_v26 }
 0x105   :  { %v2692_v27 = vpop.eup %2691 }
 0x106   :  { %v224_v30 = vmul.f32 0.0, %v2692_v27 }
 0x169   :  { %v227_v28 = vpop.permute.xlu0 %226 }
 0x16a   :  { %v229_v29 = vmul.f32 %v2692_v27, %v227_v28 }
 0x16c   :  { %231 = vrot.lane.b32.xlu0 %v229_v29, %s2901_s5 }
 0x1de   :  { %v232_v31 = vpop.permute.xlu0 %231 }
 0x1df   :  { %v234_v32 = vadd.f32 %v232_v31, %v224_v30  ;;  %v563_v31 = vld [vmem:[#allocation2 + $0x8] sm:$0x3] }
 0x1e1   :  { %2693 = vtanh.f32 %v234_v32 }
 0x1eb   :  { %v2694_v33 = vpop.eup %2693 }
 0x1ec   :  { %237 = vrot.lane.b32.xlu1 %v2694_v33, %s2900_s19 }
 0x25e   :  { %v238_v34 = vpop.permute.xlu1 %237 }
 0x25f   :  { %v240_v35 = vmul.f32 %v2692_v27, %v238_v34 }
 0x261   :  { %242 = vrot.lane.b32.xlu1 %v240_v35, %s2901_s5 }
 0x2d3   :  { %v243_v36 = vpop.permute.xlu1 %242 }
 0x2d4   :  { %246 = vst.msk [vmem:[#allocation3] sm:$0x3] %vm245_vm2, %v243_v36  ;;  %2400 = vmatmul.mubr.msk.f32.vlgmr.msra.gmra.mrb[2].mxu0 %vm142_vm3, %v243_v36 }
 0x2d5   :  { %2591 = vmatpush3.bf16.msra.mxu0 %v2992_v8  ;;  %2421 = vmatprep.mubr.msk.f32.mxu0 %vm2898_vm1, %v2899_v11 }
 0x2d6   :  { %2592 = vmatprep.subr.bf16.mxu0 %v2897_v5 }
 0x2d9   :  { %2594 = vmatpush3.bf16.msra.mxu0 %v3006_v13 }
 0x2da   :  { %2601 = vmatprep.subr.bf16.mxu0 %v2897_v5 }
 0x3a7   :  { %v317_v38 = vpop.f32.mrb[2].mxu0 }
 0x3a8   :  { %v321_v39 = vadd.f32 %v317_v38, %v248_v37  ;;  %v2401_v40 = vpop.f32.mrb[3].mxu0 }
 0x3aa   :  { %2695 = vtanh.f32 %v321_v39  ;;  %v2243_v42 = vmul.f32 -1.442695, %v321_v39 }
 0x3ac   :  { %2697 = vpow2.f32 %v2243_v42 }
 0x3b4   :  { %v2696_v41 = vpop.eup %2695 }
 0x3b5   :  { %331 = vrot.lane.b32.xlu0 %v2696_v41, %s2900_s19 }
 0x3b6   :  { %v2698_v43 = vpop.eup %2697 }
 0x3b7   :  { %v325_v44 = vadd.f32 1.0, %v2698_v43 }
 0x3b9   :  { %2699 = vrcp.f32 %v325_v44 }
 0x3c3   :  { %v2700_v45 = vpop.eup %2699 }
 0x3c4   :  { %v329_v48 = vmul.f32 %v2700_v45, %v234_v32 }
 0x427   :  { %v332_v46 = vpop.permute.xlu0 %331 }
 0x428   :  { %v334_v47 = vmul.f32 %v2700_v45, %v332_v46 }
 0x42a   :  { %336 = vrot.lane.b32.xlu1 %v334_v47, %s2901_s5 }
 0x49c   :  { %v337_v49 = vpop.permute.xlu1 %336 }
 0x49d   :  { %v339_v50 = vadd.f32 %v337_v49, %v329_v48  ;;  %v668_v49 = vld [vmem:[#allocation2 + $0xa] sm:$0x3] }
 0x49f   :  { %2701 = vtanh.f32 %v339_v50 }
 0x4a9   :  { %v2702_v51 = vpop.eup %2701 }
 0x4aa   :  { %342 = vrot.lane.b32.xlu0 %v2702_v51, %s2900_s19 }
 0x51c   :  { %v343_v52 = vpop.permute.xlu0 %342 }
 0x51d   :  { %v345_v53 = vmul.f32 %v2700_v45, %v343_v52 }
 0x51f   :  { %347 = vrot.lane.b32.xlu1 %v345_v53, %s2901_s5 }
 0x591   :  { %v348_v54 = vpop.permute.xlu1 %347 }
 0x592   :  { %351 = vst.msk [vmem:[#allocation3 + $0x2] sm:$0x3] %vm245_vm2, %v348_v54  ;;  %2411 = vmatmul.mubr.msk.f32.vlgmr.msra.gmra.mrb[2].mxu1 %vm142_vm3, %v348_v54 }
 0x593   :  { %2597 = vmatpush3.bf16.msra.mxu1 %v2992_v8  ;;  %2432 = vmatprep.mubr.msk.f32.mxu1 %vm2898_vm1, %v2899_v11 }
 0x594   :  { %2598 = vmatprep.subr.bf16.mxu1 %v2897_v5 }
 0x597   :  { %2600 = vmatpush3.bf16.msra.mxu1 %v3006_v13 }
 0x598   :  { %2607 = vmatprep.subr.bf16.mxu1 %v2897_v5 }
 0x665   :  { %v422_v56 = vpop.f32.mrb[2].mxu1 }
 0x666   :  { %v426_v57 = vadd.f32 %v422_v56, %v353_v55  ;;  %v2412_v58 = vpop.f32.mrb[3].mxu1 }
 0x668   :  { %2703 = vtanh.f32 %v426_v57  ;;  %v2245_v60 = vmul.f32 -1.442695, %v426_v57 }
 0x66a   :  { %2705 = vpow2.f32 %v2245_v60 }
 0x672   :  { %v2704_v59 = vpop.eup %2703 }
 0x673   :  { %436 = vrot.lane.b32.xlu0 %v2704_v59, %s2900_s19 }
 0x674   :  { %v2706_v61 = vpop.eup %2705 }
 0x675   :  { %v430_v62 = vadd.f32 1.0, %v2706_v61 }
 0x677   :  { %2707 = vrcp.f32 %v430_v62 }
 0x681   :  { %v2708_v63 = vpop.eup %2707 }
 0x682   :  { %v434_v2 = vmul.f32 %v2708_v63, %v339_v50 }
 0x6e5   :  { %v437_v0 = vpop.permute.xlu0 %436 }
 0x6e6   :  { %v439_v1 = vmul.f32 %v2708_v63, %v437_v0 }
 0x6e8   :  { %441 = vrot.lane.b32.xlu1 %v439_v1, %s2901_s5 }
 0x75a   :  { %v442_v3 = vpop.permute.xlu1 %441 }
 0x75b   :  { %v444_v4 = vadd.f32 %v442_v3, %v434_v2  ;;  %v773_v2 = vld [vmem:[#allocation2 + $0xc] sm:$0x3] }
 0x75d   :  { %2709 = vtanh.f32 %v444_v4 }
 0x767   :  { %v2710_v6 = vpop.eup %2709 }
 0x768   :  { %447 = vrot.lane.b32.xlu0 %v2710_v6, %s2900_s19 }
 0x7da   :  { %v448_v7 = vpop.permute.xlu0 %447 }
 0x7db   :  { %v450_v9 = vmul.f32 %v2708_v63, %v448_v7 }
 0x7dd   :  { %452 = vrot.lane.b32.xlu1 %v450_v9, %s2901_s5 }
 0x84f   :  { %v453_v10 = vpop.permute.xlu1 %452 }
 0x850   :  { %456 = vst.msk [vmem:[#allocation3 + $0x4] sm:$0x3] %vm245_vm2, %v453_v10  ;;  %2422 = vmatmul.mubr.msk.f32.vlgmr.msra.gmra.mrb[4].mxu0 %vm142_vm3, %v453_v10 }
 0x851   :  { %2603 = vmatpush3.bf16.msra.mxu0 %v2992_v8  ;;  %2443 = vmatprep.mubr.msk.f32.mxu0 %vm2898_vm1, %v2899_v11 }
 0x852   :  { %2604 = vmatprep.subr.bf16.mxu0 %v2897_v5 }
 0x855   :  { %2606 = vmatpush3.bf16.msra.mxu0 %v3006_v13 }
 0x856   :  { %2613 = vmatprep.subr.bf16.mxu0 %v2897_v5 }
 0x923   :  { %v527_v14 = vpop.f32.mrb[4].mxu0 }
 0x924   :  { %v531_v15 = vadd.f32 %v527_v14, %v458_v12  ;;  %v2423_v16 = vpop.f32.mrb[5].mxu0 }
 0x926   :  { %2711 = vtanh.f32 %v531_v15  ;;  %v2247_v18 = vmul.f32 -1.442695, %v531_v15 }
 0x928   :  { %2713 = vpow2.f32 %v2247_v18 }
 0x930   :  { %v2712_v17 = vpop.eup %2711 }
 0x931   :  { %541 = vrot.lane.b32.xlu0 %v2712_v17, %s2900_s19 }
 0x932   :  { %v2714_v19 = vpop.eup %2713 }
 0x933   :  { %v535_v20 = vadd.f32 1.0, %v2714_v19 }
 0x935   :  { %2715 = vrcp.f32 %v535_v20 }
 0x93f   :  { %v2716_v21 = vpop.eup %2715 }
 0x940   :  { %v539_v24 = vmul.f32 %v2716_v21, %v444_v4 }
 0x9a3   :  { %v542_v22 = vpop.permute.xlu0 %541 }
 0x9a4   :  { %v544_v23 = vmul.f32 %v2716_v21, %v542_v22 }
 0x9a6   :  { %546 = vrot.lane.b32.xlu1 %v544_v23, %s2901_s5 }
 0xa18   :  { %v547_v25 = vpop.permute.xlu1 %546 }
 0xa19   :  { %v549_v26 = vadd.f32 %v547_v25, %v539_v24  ;;  %v878_v24 = vld [vmem:[#allocation2 + $0xe] sm:$0x3] }
 0xa1b   :  { %2717 = vtanh.f32 %v549_v26 }
 0xa25   :  { %v2718_v27 = vpop.eup %2717 }
 0xa26   :  { %552 = vrot.lane.b32.xlu0 %v2718_v27, %s2900_s19 }
 0xa98   :  { %v553_v28 = vpop.permute.xlu0 %552 }
 0xa99   :  { %v555_v29 = vmul.f32 %v2716_v21, %v553_v28 }
 0xa9b   :  { %557 = vrot.lane.b32.xlu1 %v555_v29, %s2901_s5 }
 0xb0d   :  { %v558_v30 = vpop.permute.xlu1 %557 }
 0xb0e   :  { %561 = vst.msk [vmem:[#allocation3 + $0x6] sm:$0x3] %vm245_vm2, %v558_v30  ;;  %2433 = vmatmul.mubr.msk.f32.vlgmr.msra.gmra.mrb[4].mxu1 %vm142_vm3, %v558_v30 }
 0xb0f   :  { %2609 = vmatpush3.bf16.msra.mxu1 %v2992_v8  ;;  %2454 = vmatprep.mubr.msk.f32.mxu1 %vm2898_vm1, %v2899_v11 }
 0xb10   :  { %2610 = vmatprep.subr.bf16.mxu1 %v2897_v5 }
 0xb13   :  { %2612 = vmatpush3.bf16.msra.mxu1 %v3006_v13 }
 0xb15   :  { %v988_v1 = vld [vmem:[#allocation3] sm:$0xff] }
 0xbe1   :  { %v632_v32 = vpop.f32.mrb[4].mxu1 }
 0xbe2   :  { %v636_v33 = vadd.f32 %v632_v32, %v563_v31  ;;  %v2434_v34 = vpop.f32.mrb[5].mxu1 }
 0xbe4   :  { %2719 = vtanh.f32 %v636_v33  ;;  %v2249_v36 = vmul.f32 -1.442695, %v636_v33 }
 0xbe6   :  { %2721 = vpow2.f32 %v2249_v36 }
 0xbee   :  { %v2720_v35 = vpop.eup %2719 }
 0xbef   :  { %646 = vrot.lane.b32.xlu0 %v2720_v35, %s2900_s19 }
 0xbf0   :  { %v2722_v37 = vpop.eup %2721 }
 0xbf1   :  { %v640_v38 = vadd.f32 1.0, %v2722_v37 }
 0xbf3   :  { %2723 = vrcp.f32 %v640_v38 }
 0xbfd   :  { %v2724_v39 = vpop.eup %2723 }
 0xbfe   :  { %v644_v42 = vmul.f32 %v2724_v39, %v549_v26 }
 0xc61   :  { %v647_v40 = vpop.permute.xlu0 %646 }
 0xc62   :  { %v649_v41 = vmul.f32 %v2724_v39, %v647_v40  ;;  %v991_v40 = vld [vmem:[%s3379_s2 + $0x8] sm:$0xff] }
 0xc64   :  { %651 = vrot.lane.b32.xlu1 %v649_v41, %s2901_s5 }
 0xcd6   :  { %v652_v43 = vpop.permute.xlu1 %651 }
 0xcd7   :  { %v654_v44 = vadd.f32 %v652_v43, %v644_v42  ;;  %v992_v42 = vld [vmem:[%s3379_s2 + $0x10] sm:$0xff]  ;;  %v993_v43 = vld [vmem:[%s3379_s2 + $0x18] sm:$0xff] }
 0xcd9   :  { %2725 = vtanh.f32 %v654_v44 }
 0xce3   :  { %v2726_v45 = vpop.eup %2725 }
 0xce4   :  { %657 = vrot.lane.b32.xlu0 %v2726_v45, %s2900_s19  ;;  %v1084_v45 = vld [vmem:[%s3381_s4] sm:$0xff] }
 0xd56   :  { %v658_v46 = vpop.permute.xlu0 %657 }
 0xd57   :  { %v660_v47 = vmul.f32 %v2724_v39, %v658_v46  ;;  %v990_v39 = vld [vmem:[%s3379_s2] sm:$0xff]  ;;  %v1085_v46 = vld [vmem:[%s3381_s4 + $0x8] sm:$0xff]  ;;  %s2219_s2 = sshll.u32 %s2905_s1, 4  ;;  %s2220_s2 = int_to_ptr.vmem [resolvable:$true] %s2219_s2 }
 0xd58   :  { %v2619_v41 = vpack.c.bf16 %v991_v40, %v990_v39 }
 0xd59   :  { %662 = vrot.lane.b32.xlu1 %v660_v47, %s2901_s5  ;;  %v1086_v47 = vld [vmem:[%s3381_s4 + $0x10] sm:$0xff] }
 0xd5a   :  { %2620 = vmatprep.subr.bf16.mxu1 %v2619_v41 }
 0xdcb   :  { %v663_v48 = vpop.permute.xlu1 %662 }
 0xdcc   :  { %666 = vst.msk [vmem:[#allocation3 + $0x8] sm:$0x3] %vm245_vm2, %v663_v48  ;;  %2444 = vmatmul.mubr.msk.f32.vlgmr.msra.gmra.mrb[6].mxu0 %vm142_vm3, %v663_v48  ;;  %v3131_v48 = vpack.c.bf16 %v1085_v46, %v1084_v45 }
 0xdcd   :  { %2615 = vmatpush3.bf16.msra.mxu0 %v2992_v8  ;;  %2465 = vmatprep.mubr.msk.f32.mxu0 %vm2898_vm1, %v2899_v11 }
 0xdce   :  { %2616 = vmatprep.subr.bf16.mxu0 %v2897_v5 }
 0xdd1   :  { %2618 = vmatpush3.bf16.msra.mxu0 %v3006_v13 }
 0xdd2   :  { %2627 = vmatprep.subr.bf16.mxu0 %v2897_v5 }
 0xe9f   :  { %v737_v50 = vpop.f32.mrb[6].mxu0 }
 0xea0   :  { %v741_v51 = vadd.f32 %v737_v50, %v668_v49  ;;  %v2445_v52 = vpop.f32.mrb[7].mxu0  ;;  %v1087_v49 = vld [vmem:[%s3381_s4 + $0x18] sm:$0xff] }
 0xea1   :  { %v3137_v52 = vpack.c.bf16 %v1087_v49, %v1086_v47 }
 0xea2   :  { %2727 = vtanh.f32 %v741_v51  ;;  %v2251_v54 = vmul.f32 -1.442695, %v741_v51 }
 0xea4   :  { %2729 = vpow2.f32 %v2251_v54 }
 0xeac   :  { %v2728_v53 = vpop.eup %2727 }
 0xead   :  { %751 = vrot.lane.b32.xlu0 %v2728_v53, %s2900_s19 }
 0xeae   :  { %v2730_v8 = vpop.eup %2729 }
 0xeaf   :  { %v745_v55 = vadd.f32 1.0, %v2730_v8 }
 0xeb1   :  { %2731 = vrcp.f32 %v745_v55 }
 0xebb   :  { %v2732_v56 = vpop.eup %2731 }
 0xebc   :  { %v749_v13 = vmul.f32 %v2732_v56, %v654_v44  ;;  %v2623_v44 = vpack.c.bf16 %v993_v43, %v992_v42 }
 0xf1f   :  { %v752_v57 = vpop.permute.xlu0 %751 }
 0xf20   :  { %v754_v58 = vmul.f32 %v2732_v56, %v752_v57 }
 0xf22   :  { %756 = vrot.lane.b32.xlu1 %v754_v58, %s2901_s5 }
 0xf94   :  { %v757_v59 = vpop.permute.xlu1 %756 }
 0xf95   :  { %v759_v60 = vadd.f32 %v757_v59, %v749_v13 }
 0xf97   :  { %2733 = vtanh.f32 %v759_v60 }
 0xfa1   :  { %v2734_v61 = vpop.eup %2733 }
 0xfa2   :  { %762 = vrot.lane.b32.xlu0 %v2734_v61, %s2900_s19 }
0x1014   :  { %v763_v62 = vpop.permute.xlu0 %762 }
0x1015   :  { %v765_v63 = vmul.f32 %v2732_v56, %v763_v62  ;;  %v2256_v56 = vld [vmem:[%s3383_s6] ss:$0 sm:$0xff] }
0x1017   :  { %767 = vrot.lane.b32.xlu1 %v765_v63, %s2901_s5 }
0x1089   :  { %v768_v0 = vpop.permute.xlu1 %767 }
0x108a   :  { %771 = vst.msk [vmem:[#allocation3 + $0xa] sm:$0x3] %vm245_vm2, %v768_v0  ;;  %2455 = vmatmul.mubr.msk.f32.vlgmr.msra.gmra.mrb[6].mxu1 %vm142_vm3, %v768_v0 }
0x108b   :  { %2476 = vmatprep.mubr.msk.f32.mxu1 %vm142_vm3, %v988_v1  ;;  %2622 = vmatpush3.bf16.msra.mxu1 %v2619_v41 }
0x108c   :  { %2624 = vmatprep.subr.bf16.mxu1 %v2623_v44 }
0x108f   :  { %2626 = vmatpush3.bf16.msra.mxu1 %v2623_v44 }
0x1090   :  { %2633 = vmatprep.subr.bf16.mxu1 %v2897_v5 }
0x115d   :  { %v842_v3 = vpop.f32.mrb[6].mxu1 }
0x115e   :  { %v846_v4 = vadd.f32 %v842_v3, %v773_v2  ;;  %v2456_v6 = vpop.f32.mrb[7].mxu1 }
0x1160   :  { %2735 = vtanh.f32 %v846_v4  ;;  %v2253_v9 = vmul.f32 -1.442695, %v846_v4 }
0x1162   :  { %2737 = vpow2.f32 %v2253_v9 }
0x116a   :  { %v2736_v7 = vpop.eup %2735 }
0x116b   :  { %856 = vrot.lane.b32.xlu0 %v2736_v7, %s2900_s19 }
0x116c   :  { %v2738_v10 = vpop.eup %2737 }
0x116d   :  { %v850_v12 = vadd.f32 1.0, %v2738_v10 }
0x116f   :  { %2739 = vrcp.f32 %v850_v12 }
0x1179   :  { %v2740_v14 = vpop.eup %2739 }
0x117a   :  { %v854_v17 = vmul.f32 %v2740_v14, %v759_v60 }
0x11dd   :  { %v857_v15 = vpop.permute.xlu0 %856 }
0x11de   :  { %v859_v16 = vmul.f32 %v2740_v14, %v857_v15 }
0x11e0   :  { %861 = vrot.lane.b32.xlu1 %v859_v16, %s2901_s5 }
0x1252   :  { %v862_v18 = vpop.permute.xlu1 %861 }
0x1253   :  { %v864_v19 = vadd.f32 %v862_v18, %v854_v17 }
0x1255   :  { %2741 = vtanh.f32 %v864_v19 }
0x125f   :  { %v2742_v20 = vpop.eup %2741 }
0x1260   :  { %867 = vrot.lane.b32.xlu0 %v2742_v20, %s2900_s19 }
0x12d2   :  { %v868_v21 = vpop.permute.xlu0 %867 }
0x12d3   :  { %v870_v22 = vmul.f32 %v2740_v14, %v868_v21 }
0x12d5   :  { %872 = vrot.lane.b32.xlu1 %v870_v22, %s2901_s5 }
0x1347   :  { %v873_v23 = vpop.permute.xlu1 %872 }
0x1348   :  { %876 = vst.msk [vmem:[#allocation3 + $0xc] sm:$0x3] %vm245_vm2, %v873_v23  ;;  %2466 = vmatmul.mubr.msk.f32.vlgmr.msra.gmra.mrb[8].mxu0 %vm142_vm3, %v873_v23 }
0x1349   :  { %2487 = vmatprep.mubr.msk.f32.mxu0 %vm2898_vm1, %v2899_v11  ;;  %2629 = vmatpush3.bf16.msra.mxu0 %v3131_v48 }
0x134a   :  { %2630 = vmatprep.subr.bf16.mxu0 %v2897_v5 }
0x134d   :  { %2632 = vmatpush3.bf16.msra.mxu0 %v3137_v52 }
0x134e   :  { %2639 = vmatprep.subr.bf16.mxu0 %v2897_v5 }
0x1350   :  { %2488 = vmatmul.mubr.f32.vlgmr.msra.gmra.mrb[10].mxu0 %v2899_v11 }
0x1351   :  { %2641 = vmatpush3.bf16.msra.mxu0 %v3131_v48  ;;  %2509 = vmatprep.mubr.msk.f32.mxu0 %vm2898_vm1, %v2899_v11 }
0x1352   :  { %2642 = vmatprep.subr.bf16.mxu0 %v2897_v5 }
0x1355   :  { %2644 = vmatpush3.bf16.msra.mxu0 %v3137_v52 }
0x1356   :  { %2651 = vmatprep.subr.bf16.mxu0 %v2897_v5 }
0x141b   :  { %v947_v25 = vpop.f32.mrb[8].mxu0 }
0x141c   :  { %v951_v26 = vadd.f32 %v947_v25, %v878_v24  ;;  %v2467_v27 = vpop.f32.mrb[9].mxu0 }
0x141e   :  { %2743 = vtanh.f32 %v951_v26  ;;  %v2255_v29 = vmul.f32 -1.442695, %v951_v26 }
0x1420   :  { %2745 = vpow2.f32 %v2255_v29 }
0x1423   :  { %v1155_v8 = vpop.f32.mrb[10].mxu0 }
0x1424   :  { %v2489_v55 = vpop.f32.mrb[11].mxu0 }
0x1428   :  { %v2744_v28 = vpop.eup %2743 }
0x1429   :  { %961 = vrot.lane.b32.xlu0 %v2744_v28, %s2900_s19 }
0x142a   :  { %v2746_v30 = vpop.eup %2745 }
0x142b   :  { %v955_v31 = vadd.f32 1.0, %v2746_v30 }
0x142d   :  { %2747 = vrcp.f32 %v955_v31 }
0x1437   :  { %v2748_v32 = vpop.eup %2747 }
0x1438   :  { %v959_v35 = vmul.f32 %v2748_v32, %v864_v19 }
0x149b   :  { %v962_v33 = vpop.permute.xlu0 %961 }
0x149c   :  { %v964_v34 = vmul.f32 %v2748_v32, %v962_v33 }
0x149e   :  { %966 = vrot.lane.b32.xlu1 %v964_v34, %s2901_s5 }
0x1510   :  { %v967_v36 = vpop.permute.xlu1 %966 }
0x1511   :  { %v3105_v37 = vadd.f32 %v967_v36, %v959_v35 }
0x1513   :  { %2749 = vtanh.f32 %v3105_v37 }
0x151d   :  { %v2750_v38 = vpop.eup %2749 }
0x151e   :  { %972 = vrot.lane.b32.xlu0 %v2750_v38, %s2900_s19 }
0x1590   :  { %v973_v50 = vpop.permute.xlu0 %972 }
0x1591   :  { %v975_v51 = vmul.f32 %v2748_v32, %v973_v50 }
0x1593   :  { %977 = vrot.lane.b32.xlu1 %v975_v51, %s2901_s5 }
0x1605   :  { %v978_v53 = vpop.permute.xlu1 %977 }
0x1606   :  { %981 = vst.msk [vmem:[#allocation3 + $0xe] sm:$0x3] %vm245_vm2, %v978_v53  ;;  %982 = vst.msk [vmem:[#allocation5] sm:$0x3] %vm245_vm2, %v978_v53 }
0x160d   :  { %v989_v54 = vld [vmem:[#allocation3 + $0x8] sm:$0xff] }
0x160e   :  { %2477 = vmatmul.mubr.msk.f32.vlgmr.msra.gmra.mrb[8].mxu1 %vm142_vm3, %v989_v54 }
0x160f   :  { %2635 = vmatpush3.bf16.msra.mxu1 %v3131_v48  ;;  %2498 = vmatprep.mubr.msk.f32.mxu1 %vm2898_vm1, %v2899_v11 }
0x1610   :  { %2636 = vmatprep.subr.bf16.mxu1 %v2897_v5 }
0x1613   :  { %2638 = vmatpush3.bf16.msra.mxu1 %v3137_v52 }
0x1614   :  { %2645 = vmatprep.subr.bf16.mxu1 %v2897_v5 }
0x16e1   :  { %v2478_v57 = vpop.f32.mrb[8].mxu1 }
0x16e2   :  { %v1079_v58 = vadd.f32 %v2478_v57, %v2256_v56  ;;  %v1073_v13 = vpop.f32.mrb[9].mxu1 }
0x16e3   :  { %v1074_v59 = vadd.f32 %v2256_v56, %v1073_v13 }
0x16e4   :  { %1083 = vst [vmem:[#allocation2 + $0x8] sm:$0xff] %v1079_v58 }
0x16e5   :  { %1082 = vst [vmem:[#allocation2] sm:$0xff] %v1074_v59 }
0x16ec   :  { %v1088_v60 = vld [vmem:[#allocation2] sm:$0x3]  ;;  %v1233_v16 = vld [vmem:[#allocation2 + $0x2] sm:$0x3]  ;;  %v1368_v34 = vld [vmem:[#allocation2 + $0x4] sm:$0x3] }
0x16ed   :  { %v1159_v61 = vadd.f32 %v1155_v8, %v1088_v60  ;;  %v1503_v8 = vld [vmem:[#allocation2 + $0x6] sm:$0x3] }
0x16ef   :  { %2751 = vtanh.f32 %v1159_v61  ;;  %v2259_v63 = vmul.f32 -1.442695, %v1159_v61 }
0x16f1   :  { %2753 = vpow2.f32 %v2259_v63 }
0x16f9   :  { %v2752_v62 = vpop.eup %2751 }
0x16fa   :  { %1169 = vrot.lane.b32.xlu0 %v2752_v62, %s2900_s19 }
0x16fb   :  { %v2754_v0 = vpop.eup %2753 }
0x16fc   :  { %v1163_v1 = vadd.f32 1.0, %v2754_v0 }
0x16fe   :  { %2755 = vrcp.f32 %v1163_v1 }
0x1708   :  { %v2756_v2 = vpop.eup %2755 }
0x1709   :  { %v1167_v6 = vmul.f32 0.0, %v2756_v2 }
0x176c   :  { %v1170_v3 = vpop.permute.xlu0 %1169 }
0x176d   :  { %v1172_v4 = vmul.f32 %v2756_v2, %v1170_v3 }
0x176f   :  { %1174 = vrot.lane.b32.xlu1 %v1172_v4, %s2901_s5 }
0x17e1   :  { %v1175_v7 = vpop.permute.xlu1 %1174 }
0x17e2   :  { %v1177_v9 = vadd.f32 %v1175_v7, %v1167_v6 }
0x17e4   :  { %2757 = vtanh.f32 %v1177_v9 }
0x17ee   :  { %v2758_v10 = vpop.eup %2757 }
0x17ef   :  { %1180 = vrot.lane.b32.xlu0 %v2758_v10, %s2900_s19 }
0x1861   :  { %v1181_v12 = vpop.permute.xlu0 %1180 }
0x1862   :  { %v3165_v14 = vmul.f32 %v2756_v2, %v1181_v12 }
0x1864   :  { %1185 = vrot.lane.b32.xlu1 %v3165_v14, %s2901_s5 }
0x18d6   :  { %v1186_v15 = vpop.permute.xlu1 %1185 }
0x18d7   :  { %1188 = vst.msk [vmem:[%s3386_s9] sm:$0x3] %vm245_vm2, %v1186_v15  ;;  %2499 = vmatmul.mubr.msk.f32.vlgmr.msra.gmra.mrb[10].mxu1 %vm142_vm3, %v1186_v15 }
0x18d8   :  { %2647 = vmatpush3.bf16.msra.mxu1 %v3131_v48  ;;  %2520 = vmatprep.mubr.msk.f32.mxu1 %vm2898_vm1, %v2899_v11 }
0x18d9   :  { %2648 = vmatprep.subr.bf16.mxu1 %v2897_v5 }
0x18dc   :  { %2650 = vmatpush3.bf16.msra.mxu1 %v3137_v52 }
0x18dd   :  { %2657 = vmatprep.subr.bf16.mxu1 %v2897_v5 }
0x19aa   :  { %v1302_v17 = vpop.f32.mrb[10].mxu1 }
0x19ab   :  { %v1306_v18 = vadd.f32 %v1302_v17, %v1233_v16  ;;  %v2500_v19 = vpop.f32.mrb[11].mxu1 }
0x19ad   :  { %2759 = vtanh.f32 %v1306_v18  ;;  %v2263_v21 = vmul.f32 -1.442695, %v1306_v18 }
0x19af   :  { %2761 = vpow2.f32 %v2263_v21 }
0x19b7   :  { %v2760_v20 = vpop.eup %2759 }
0x19b8   :  { %1316 = vrot.lane.b32.xlu0 %v2760_v20, %s2900_s19 }
0x19b9   :  { %v2762_v22 = vpop.eup %2761 }
0x19ba   :  { %v1310_v23 = vadd.f32 1.0, %v2762_v22 }
0x19bc   :  { %2763 = vrcp.f32 %v1310_v23 }
0x19c6   :  { %v2764_v24 = vpop.eup %2763 }
0x19c7   :  { %v1314_v27 = vmul.f32 %v2764_v24, %v1177_v9  ;;  %v1638_v9 = vld [vmem:[#allocation2 + $0x8] sm:$0x3] }
0x1a2a   :  { %v1317_v25 = vpop.permute.xlu0 %1316 }
0x1a2b   :  { %v1319_v26 = vmul.f32 %v2764_v24, %v1317_v25 }
0x1a2d   :  { %1321 = vrot.lane.b32.xlu1 %v1319_v26, %s2901_s5 }
0x1a9f   :  { %v1322_v28 = vpop.permute.xlu1 %1321 }
0x1aa0   :  { %v1324_v29 = vadd.f32 %v1322_v28, %v1314_v27 }
0x1aa2   :  { %2765 = vtanh.f32 %v1324_v29 }
0x1aac   :  { %v2766_v30 = vpop.eup %2765 }
0x1aad   :  { %1327 = vrot.lane.b32.xlu0 %v2766_v30, %s2900_s19  ;;  %v1773_v30 = vld [vmem:[#allocation2 + $0xa] sm:$0x3] }
0x1b1f   :  { %v1328_v31 = vpop.permute.xlu0 %1327 }
0x1b20   :  { %v3183_v32 = vmul.f32 %v2764_v24, %v1328_v31 }
0x1b22   :  { %1332 = vrot.lane.b32.xlu1 %v3183_v32, %s2901_s5 }
0x1b94   :  { %v1333_v33 = vpop.permute.xlu1 %1332 }
0x1b95   :  { %2264 = vst.msk [vmem:[%s3386_s9 + $0x2] sm:$0x3] %vm245_vm2, %v1333_v33  ;;  %2510 = vmatmul.mubr.msk.f32.vlgmr.msra.gmra.mrb[12].mxu0 %vm142_vm3, %v1333_v33 }
0x1b96   :  { %2653 = vmatpush3.bf16.msra.mxu0 %v3131_v48  ;;  %2531 = vmatprep.mubr.msk.f32.mxu0 %vm2898_vm1, %v2899_v11 }
0x1b97   :  { %2654 = vmatprep.subr.bf16.mxu0 %v2897_v5 }
0x1b9a   :  { %2656 = vmatpush3.bf16.msra.mxu0 %v3137_v52 }
0x1b9b   :  { %2663 = vmatprep.subr.bf16.mxu0 %v2897_v5 }
0x1c68   :  { %v1437_v35 = vpop.f32.mrb[12].mxu0 }
0x1c69   :  { %v1441_v36 = vadd.f32 %v1437_v35, %v1368_v34  ;;  %v2511_v38 = vpop.f32.mrb[13].mxu0 }
0x1c6b   :  { %2767 = vtanh.f32 %v1441_v36  ;;  %v2266_v40 = vmul.f32 -1.442695, %v1441_v36 }
0x1c6d   :  { %2769 = vpow2.f32 %v2266_v40 }
0x1c75   :  { %v2768_v39 = vpop.eup %2767 }
0x1c76   :  { %1451 = vrot.lane.b32.xlu0 %v2768_v39, %s2900_s19 }
0x1c77   :  { %v2770_v41 = vpop.eup %2769 }
0x1c78   :  { %v1445_v42 = vadd.f32 1.0, %v2770_v41 }
0x1c7a   :  { %2771 = vrcp.f32 %v1445_v42 }
0x1c84   :  { %v2772_v43 = vpop.eup %2771 }
0x1c85   :  { %v1449_v46 = vmul.f32 %v2772_v43, %v1324_v29 }
0x1ce8   :  { %v1452_v44 = vpop.permute.xlu0 %1451 }
0x1ce9   :  { %v1454_v45 = vmul.f32 %v2772_v43, %v1452_v44 }
0x1ceb   :  { %1456 = vrot.lane.b32.xlu1 %v1454_v45, %s2901_s5 }
0x1d5d   :  { %v1457_v47 = vpop.permute.xlu1 %1456 }
0x1d5e   :  { %v1459_v49 = vadd.f32 %v1457_v47, %v1449_v46  ;;  %v1908_v46 = vld [vmem:[#allocation2 + $0xc] sm:$0x3] }
0x1d60   :  { %2773 = vtanh.f32 %v1459_v49 }
0x1d6a   :  { %v2774_v50 = vpop.eup %2773 }
0x1d6b   :  { %1462 = vrot.lane.b32.xlu0 %v2774_v50, %s2900_s19 }
0x1ddd   :  { %v1463_v51 = vpop.permute.xlu0 %1462 }
0x1dde   :  { %v3201_v53 = vmul.f32 %v2772_v43, %v1463_v51 }
0x1de0   :  { %1467 = vrot.lane.b32.xlu1 %v3201_v53, %s2901_s5 }
0x1e52   :  { %v1468_v54 = vpop.permute.xlu1 %1467 }
0x1e53   :  { %2267 = vst.msk [vmem:[%s3386_s9 + $0x4] sm:$0x3] %vm245_vm2, %v1468_v54  ;;  %2521 = vmatmul.mubr.msk.f32.vlgmr.msra.gmra.mrb[12].mxu1 %vm142_vm3, %v1468_v54 }
0x1e54   :  { %2659 = vmatpush3.bf16.msra.mxu1 %v3131_v48  ;;  %2542 = vmatprep.mubr.msk.f32.mxu1 %vm2898_vm1, %v2899_v11 }
0x1e55   :  { %2660 = vmatprep.subr.bf16.mxu1 %v2897_v5 }
0x1e58   :  { %2662 = vmatpush3.bf16.msra.mxu1 %v3137_v52 }
0x1e59   :  { %2669 = vmatprep.subr.bf16.mxu1 %v2897_v5 }
0x1f26   :  { %v1572_v55 = vpop.f32.mrb[12].mxu1 }
0x1f27   :  { %v1576_v56 = vadd.f32 %v1572_v55, %v1503_v8  ;;  %v2522_v57 = vpop.f32.mrb[13].mxu1 }
0x1f29   :  { %2775 = vtanh.f32 %v1576_v56  ;;  %v2269_v13 = vmul.f32 -1.442695, %v1576_v56 }
0x1f2b   :  { %2777 = vpow2.f32 %v2269_v13 }
0x1f33   :  { %v2776_v58 = vpop.eup %2775 }
0x1f34   :  { %1586 = vrot.lane.b32.xlu0 %v2776_v58, %s2900_s19 }
0x1f35   :  { %v2778_v59 = vpop.eup %2777 }
0x1f36   :  { %v1580_v60 = vadd.f32 1.0, %v2778_v59 }
0x1f38   :  { %2779 = vrcp.f32 %v1580_v60 }
0x1f42   :  { %v2780_v61 = vpop.eup %2779 }
0x1f43   :  { %v1584_v0 = vmul.f32 %v2780_v61, %v1459_v49 }
0x1fa6   :  { %v1587_v62 = vpop.permute.xlu0 %1586 }
0x1fa7   :  { %v1589_v63 = vmul.f32 %v2780_v61, %v1587_v62 }
0x1fa9   :  { %1591 = vrot.lane.b32.xlu1 %v1589_v63, %s2901_s5 }
0x201b   :  { %v1592_v1 = vpop.permute.xlu1 %1591 }
0x201c   :  { %v1594_v2 = vadd.f32 %v1592_v1, %v1584_v0  ;;  %v2043_v1 = vld [vmem:[#allocation2 + $0xe] sm:$0x3] }
0x201e   :  { %2781 = vtanh.f32 %v1594_v2 }
0x2028   :  { %v2782_v3 = vpop.eup %2781 }
0x2029   :  { %1597 = vrot.lane.b32.xlu0 %v2782_v3, %s2900_s19 }
0x209b   :  { %v1598_v4 = vpop.permute.xlu0 %1597 }
0x209c   :  { %v3219_v6 = vmul.f32 %v2780_v61, %v1598_v4 }
0x209e   :  { %1602 = vrot.lane.b32.xlu1 %v3219_v6, %s2901_s5 }
0x2110   :  { %v1603_v7 = vpop.permute.xlu1 %1602 }
0x2111   :  { %2270 = vst.msk [vmem:[%s3386_s9 + $0x6] sm:$0x3] %vm245_vm2, %v1603_v7  ;;  %2532 = vmatmul.mubr.msk.f32.vlgmr.msra.gmra.mrb[14].mxu0 %vm142_vm3, %v1603_v7 }
0x2112   :  { %2665 = vmatpush3.bf16.msra.mxu0 %v3131_v48  ;;  %2553 = vmatprep.mubr.msk.f32.mxu0 %vm2898_vm1, %v2899_v11 }
0x2113   :  { %2666 = vmatprep.subr.bf16.mxu0 %v2897_v5 }
0x2116   :  { %2668 = vmatpush3.bf16.msra.mxu0 %v3137_v52 }
0x21e4   :  { %v1707_v10 = vpop.f32.mrb[14].mxu0 }
0x21e5   :  { %v1711_v12 = vadd.f32 %v1707_v10, %v1638_v9  ;;  %v2533_v15 = vpop.f32.mrb[15].mxu0  ;;  %v2260_v9 = vld [vmem:[%s3384_s7] ss:$0 sm:$0xff] }
0x21e7   :  { %2783 = vtanh.f32 %v1711_v12  ;;  %v2272_v17 = vmul.f32 -1.442695, %v1711_v12 }
0x21e9   :  { %2785 = vpow2.f32 %v2272_v17 }
0x21f1   :  { %v2784_v16 = vpop.eup %2783 }
0x21f2   :  { %1721 = vrot.lane.b32.xlu0 %v2784_v16, %s2900_s19 }
0x21f3   :  { %v2786_v18 = vpop.eup %2785 }
0x21f4   :  { %v1715_v19 = vadd.f32 1.0, %v2786_v18 }
0x21f6   :  { %2787 = vrcp.f32 %v1715_v19 }
0x2200   :  { %v2788_v20 = vpop.eup %2787 }
0x2201   :  { %v1719_v23 = vmul.f32 %v2788_v20, %v1594_v2 }
0x2264   :  { %v1722_v21 = vpop.permute.xlu0 %1721 }
0x2265   :  { %v1724_v22 = vmul.f32 %v2788_v20, %v1722_v21 }
0x2267   :  { %1726 = vrot.lane.b32.xlu1 %v1724_v22, %s2901_s5 }
0x22d9   :  { %v1727_v24 = vpop.permute.xlu1 %1726 }
0x22da   :  { %v1729_v25 = vadd.f32 %v1727_v24, %v1719_v23 }
0x22dc   :  { %2789 = vtanh.f32 %v1729_v25 }
0x22e6   :  { %v2790_v26 = vpop.eup %2789 }
0x22e7   :  { %1732 = vrot.lane.b32.xlu0 %v2790_v26, %s2900_s19 }
0x2359   :  { %v1733_v27 = vpop.permute.xlu0 %1732 }
0x235a   :  { %v3236_v28 = vmul.f32 %v2788_v20, %v1733_v27 }
0x235c   :  { %1737 = vrot.lane.b32.xlu1 %v3236_v28, %s2901_s5 }
0x23ce   :  { %v1738_v29 = vpop.permute.xlu1 %1737 }
0x23cf   :  { %2273 = vst.msk [vmem:[%s3386_s9 + $0x8] sm:$0x3] %vm245_vm2, %v1738_v29  ;;  %2543 = vmatmul.mubr.msk.f32.vlgmr.msra.gmra.mrb[14].mxu1 %vm142_vm3, %v1738_v29 }
0x23d0   :  { %2671 = vmatpush3.bf16.msra.mxu1 %v3131_v48  ;;  %2564 = vmatprep.mubr.msk.f32.mxu1 %vm2898_vm1, %v2899_v11 }
0x23d1   :  { %2672 = vmatprep.subr.bf16.mxu1 %v2897_v5 }
0x23d4   :  { %2674 = vmatpush3.bf16.msra.mxu1 %v3137_v52 }
0x24a2   :  { %v1842_v31 = vpop.f32.mrb[14].mxu1 }
0x24a3   :  { %v1846_v33 = vadd.f32 %v1842_v31, %v1773_v30  ;;  %v2544_v34 = vpop.f32.mrb[15].mxu1 }
0x24a4   :  { %v2903_v34 = vmov 0  }
0x24a5   :  { %2791 = vtanh.f32 %v1846_v33  ;;  %v2275_v36 = vmul.f32 -1.442695, %v1846_v33  ;;  %2685 = vset.pattern.permute.xlu0 %v2903_v34  ;;  %2686 = vset.pattern.permute.xlu1 %v2903_v34 }
0x24a7   :  { %2793 = vpow2.f32 %v2275_v36 }
0x24af   :  { %v2792_v35 = vpop.eup %2791 }
0x24b0   :  { %1856 = vrot.lane.b32.xlu0 %v2792_v35, %s2900_s19 }
0x24b1   :  { %v2794_v38 = vpop.eup %2793 }
0x24b2   :  { %v1850_v39 = vadd.f32 1.0, %v2794_v38 }
0x24b4   :  { %2795 = vrcp.f32 %v1850_v39 }
0x24be   :  { %v2796_v48 = vpop.eup %2795 }
0x24bf   :  { %v1854_v5 = vmul.f32 %v2796_v48, %v1729_v25 }
0x2522   :  { %v1857_v40 = vpop.permute.xlu0 %1856 }
0x2523   :  { %v1859_v11 = vmul.f32 %v2796_v48, %v1857_v40  ;;  %v3305_v40 = vld [vmem:[#allocation4] ss:$0 sm:$0xff] }
0x2525   :  { %1861 = vrot.lane.b32.xlu1 %v1859_v11, %s2901_s5 }
0x2597   :  { %v1862_v52 = vpop.permute.xlu1 %1861 }
0x2598   :  { %v1864_v41 = vadd.f32 %v1862_v52, %v1854_v5 }
0x259a   :  { %2797 = vtanh.f32 %v1864_v41 }
0x25a4   :  { %v2798_v42 = vpop.eup %2797 }
0x25a5   :  { %1867 = vrot.lane.b32.xlu0 %v2798_v42, %s2900_s19 }
0x2617   :  { %v1868_v43 = vpop.permute.xlu0 %1867 }
0x2618   :  { %v3253_v44 = vmul.f32 %v2796_v48, %v1868_v43 }
0x261a   :  { %1872 = vrot.lane.b32.xlu1 %v3253_v44, %s2901_s5 }
0x268c   :  { %v1873_v45 = vpop.permute.xlu1 %1872 }
0x268d   :  { %2276 = vst.msk [vmem:[%s3386_s9 + $0xa] sm:$0x3] %vm245_vm2, %v1873_v45  ;;  %2554 = vmatmul.mubr.msk.f32.vlgmr.msra.gmra.mrb[16].mxu0 %vm142_vm3, %v1873_v45 }
0x2760   :  { %v1977_v47 = vpop.f32.mrb[16].mxu0 }
0x2761   :  { %v1981_v49 = vadd.f32 %v1977_v47, %v1908_v46  ;;  %v2555_v50 = vpop.f32.mrb[17].mxu0 }
0x2763   :  { %2799 = vtanh.f32 %v1981_v49  ;;  %v2278_v54 = vmul.f32 -1.442695, %v1981_v49 }
0x2765   :  { %2801 = vpow2.f32 %v2278_v54 }
0x276d   :  { %v2800_v51 = vpop.eup %2799 }
0x276e   :  { %1991 = vrot.lane.b32.xlu0 %v2800_v51, %s2900_s19 }
0x276f   :  { %v2802_v8 = vpop.eup %2801 }
0x2770   :  { %v1985_v55 = vadd.f32 1.0, %v2802_v8 }
0x2772   :  { %2803 = vrcp.f32 %v1985_v55 }
0x277c   :  { %v2804_v56 = vpop.eup %2803 }
0x277d   :  { %v1989_v13 = vmul.f32 %v2804_v56, %v1864_v41 }
0x27e0   :  { %v1992_v57 = vpop.permute.xlu0 %1991 }
0x27e1   :  { %v1994_v58 = vmul.f32 %v2804_v56, %v1992_v57 }
0x27e3   :  { %1996 = vrot.lane.b32.xlu1 %v1994_v58, %s2901_s5 }
0x2855   :  { %v1997_v59 = vpop.permute.xlu1 %1996 }
0x2856   :  { %v1999_v60 = vadd.f32 %v1997_v59, %v1989_v13 }
0x2858   :  { %2805 = vtanh.f32 %v1999_v60 }
0x2862   :  { %v2806_v61 = vpop.eup %2805 }
0x2863   :  { %2002 = vrot.lane.b32.xlu0 %v2806_v61, %s2900_s19 }
0x28d5   :  { %v2003_v62 = vpop.permute.xlu0 %2002 }
0x28d6   :  { %v3265_v63 = vmul.f32 %v2804_v56, %v2003_v62 }
0x28d8   :  { %2007 = vrot.lane.b32.xlu1 %v3265_v63, %s2901_s5 }
0x294a   :  { %v2008_v0 = vpop.permute.xlu1 %2007 }
0x294b   :  { %2279 = vst.msk [vmem:[%s3386_s9 + $0xc] sm:$0x3] %vm245_vm2, %v2008_v0  ;;  %2565 = vmatmul.mubr.msk.f32.vlgmr.msra.gmra.mrb[16].mxu1 %vm142_vm3, %v2008_v0 }
0x2a1e   :  { %v2112_v2 = vpop.f32.mrb[16].mxu1 }
0x2a1f   :  { %v2116_v3 = vadd.f32 %v2112_v2, %v2043_v1  ;;  %v2566_v4 = vpop.f32.mrb[17].mxu1 }
0x2a21   :  { %2807 = vtanh.f32 %v2116_v3  ;;  %v2281_v10 = vmul.f32 -1.442695, %v2116_v3 }
0x2a23   :  { %2809 = vpow2.f32 %v2281_v10 }
0x2a2b   :  { %v2808_v7 = vpop.eup %2807 }
0x2a2c   :  { %2126 = vrot.lane.b32.xlu0 %v2808_v7, %s2900_s19 }
0x2a2d   :  { %v2810_v12 = vpop.eup %2809 }
0x2a2e   :  { %v2120_v15 = vadd.f32 1.0, %v2810_v12 }
0x2a30   :  { %1194 = vrot.lane.b32.xlu0 %v2260_v9, %s2902_s29  ;;  %2811 = vrcp.f32 %v2120_v15 }
0x2a3a   :  { %v2812_v16 = vpop.eup %2811 }
0x2a3b   :  { %v2124_v22 = vmul.f32 %v2812_v16, %v1999_v60 }
0x2a9e   :  { %v2127_v17 = vpop.permute.xlu0 %2126 }
0x2a9f   :  { %v2129_v18 = vmul.f32 %v2812_v16, %v2127_v17 }
0x2aa1   :  { %2131 = vrot.lane.b32.xlu1 %v2129_v18, %s2901_s5 }
0x2aa2   :  { %v1195_v19 = vpop.permute.xlu0 %1194 }
0x2aa3   :  { %v1197_v20 = vmul.f32 %v1195_v19, %v3165_v14  ;;  %v1337_v21 = vmul.f32 %v3183_v32, %v1195_v19  ;;  %v1472_v29 = vmul.f32 %v3201_v53, %v1195_v19  ;;  %v1607_v30 = vmul.f32 %v3219_v6, %v1195_v19 }
0x2aa4   :  { %v1877_v31 = vmul.f32 %v3253_v44, %v1195_v19  ;;  %v2012_v33 = vmul.f32 %v3265_v63, %v1195_v19  ;;  %v1742_v8 = vmul.f32 %v3236_v28, %v1195_v19 }
0x2aa5   :  { %984 = vrot.lane.b32.xlu1 %v3105_v37, %s2902_s29  ;;  %1199 = vrot.lane.b32.xlu0 %v1197_v20, %s2901_s5 }
0x2aa9   :  { %1339 = vrot.lane.b32.xlu0 %v1337_v21, %s2901_s5 }
0x2b13   :  { %v2132_v23 = vpop.permute.xlu1 %2131 }
0x2b14   :  { %v3286_v24 = vadd.f32 %v2132_v23, %v2124_v22 }
0x2b16   :  { %2813 = vtanh.f32 %v3286_v24 }
0x2b17   :  { %v985_v25 = vpop.permute.xlu1 %984  ;;  %v1200_v26 = vpop.permute.xlu0 %1199 }
0x2b18   :  { %987 = vst.msk [vmem:[#allocation7] sm:$0x3] %vm245_vm2, %v985_v25  ;;  %v1202_v27 = vsel %vm245_vm2, %v1200_v26, 0.0 }
0x2b19   :  { %1203 = vadd.xlane.f32.xlu1 %v1202_v27 }
0x2b1b   :  { %v1340_v35 = vpop.permute.xlu0 %1339 }
0x2b1c   :  { %v1342_v36 = vsel %vm245_vm2, %v1340_v35, 0.0 }
0x2b20   :  { %v2814_v37 = vpop.eup %2813 }
0x2b21   :  { %2137 = vrot.lane.b32.xlu0 %v2814_v37, %s2900_s19 }
0x2b2a   :  { %1474 = vrot.lane.b32.xlu1 %v1472_v29, %s2901_s5 }
0x2b2e   :  { %1609 = vrot.lane.b32.xlu1 %v1607_v30, %s2901_s5 }
0x2b32   :  { %1879 = vrot.lane.b32.xlu1 %v1877_v31, %s2901_s5 }
0x2b36   :  { %2014 = vrot.lane.b32.xlu1 %v2012_v33, %s2901_s5 }
0x2b40   :  { %1343 = vadd.xlane.f32.xlu0 %v1342_v36 }
0x2b93   :  { %v2138_v38 = vpop.permute.xlu0 %2137 }
0x2b94   :  { %v3301_v39 = vmul.f32 %v2812_v16, %v2138_v38 }
0x2b96   :  { %v2147_v48 = vmul.f32 %v3301_v39, %v1195_v19 }
0x2b98   :  { %2149 = vrot.lane.b32.xlu1 %v2147_v48, %s2901_s5 }
0x2ba6   :  { %v1204_v11 = vpop.xlane.xlu1 %1203 }
0x2ba7   :  { %v1211_v5 = vadd.f32 %v3305_v40, %v1204_v11 }
0x2ba9   :  { %v1212_v52 = vsub.f32 -inf, %v1211_v5  ;;  %v1215_v41 = vsub.f32 %v1211_v5, %v1211_v5 }
0x2baa   :  { %v1475_v45 = vpop.permute.xlu1 %1474 }
0x2bab   :  { %v1213_v42 = vmul.f32 1.442695, %v1212_v52  ;;  %v1216_v43 = vmul.f32 1.442695, %v1215_v41  ;;  %v1477_v61 = vsel %vm245_vm2, %v1475_v45, 0.0 }
0x2bad   :  { %2815 = vpow2.f32 %v1213_v42 }
0x2bae   :  { %2817 = vpow2.f32 %v1216_v43  ;;  %v1610_v47 = vpop.permute.xlu1 %1609 }
0x2baf   :  { %v1612_v54 = vsel %vm245_vm2, %v1610_v47, 0.0 }
0x2bb2   :  { %v1880_v3 = vpop.permute.xlu1 %1879 }
0x2bb3   :  { %v1882_v20 = vsel %vm245_vm2, %v1880_v3, 0.0 }
0x2bb6   :  { %v2015_v4 = vpop.permute.xlu1 %2014 }
0x2bb7   :  { %v2816_v46 = vpop.eup %2815  ;;  %v2017_v21 = vsel %vm245_vm2, %v2015_v4, 0.0 }
0x2bb8   :  { %1222 = vperm.xlu0 %2685, %v2816_v46   ;;  %v1218_v49 = vmul.f32 0.0, %v2816_v46  ;;  %v2818_v50 = vpop.eup %2817 }
0x2bba   :  { %v1219_v51 = vadd.f32 %v2818_v50, %v1218_v49 }
0x2bbc   :  { %1228 = vperm.xlu0 %2685, %v2818_v50   ;;  %1613 = vadd.xlane.f32.xlu1 %v1612_v54 }
0x2bc0   :  { %1744 = vrot.lane.b32.xlu0 %v1742_v8, %s2901_s5 }
0x2bcd   :  { %v1344_v55 = vpop.xlane.xlu0 %1343 }
0x2bce   :  { %v1345_v56 = vadd.f32 %v3305_v40, %v1344_v55 }
0x2bd0   :  { %v1346_v57 = vmax.f32 %v1211_v5, %v1345_v56 }
0x2bd2   :  { %v1347_v58 = vsub.f32 %v1211_v5, %v1346_v57  ;;  %v1350_v13 = vsub.f32 %v1345_v56, %v1346_v57 }
0x2bd4   :  { %v1348_v59 = vmul.f32 1.442695, %v1347_v58  ;;  %v1351_v60 = vmul.f32 1.442695, %v1350_v13 }
0x2bd6   :  { %2819 = vpow2.f32 %v1348_v59 }
0x2bd7   :  { %2821 = vpow2.f32 %v1351_v60 }
0x2bdf   :  { %1478 = vadd.xlane.f32.xlu0 %v1477_v61 }
0x2be0   :  { %v2820_v62 = vpop.eup %2819 }
0x2be1   :  { %v1353_v0 = vmul.f32 %v2820_v62, %v1219_v51  ;;  %v2822_v1 = vpop.eup %2821 }
0x2be3   :  { %v1354_v2 = vadd.f32 %v2822_v1, %v1353_v0 }
0x2c0a   :  { %v2150_v7 = vpop.permute.xlu1 %2149 }
0x2c0b   :  { %v2152_v9 = vsel %vm245_vm2, %v2150_v7, 0.0 }
0x2c0c   :  { %2153 = vadd.xlane.f32.xlu1 %v2152_v9 }
0x2c1d   :  { %1357 = vperm.xlu1 %2686, %v2820_v62  }
0x2c21   :  { %1363 = vperm.xlu1 %2686, %v2822_v1  }
0x2c37   :  { %v1223_v10 = vpop.permute.xlu0 %1222 }
0x2c38   :  { %v1225_v15 = vmul.f32 0.0, %v1223_v10 }
0x2c3b   :  { %v1229_v12 = vpop.permute.xlu0 %1228 }
0x2c3c   :  { %v1231_v16 = vmul.f32 %v1229_v12, %v3165_v14 }
0x2c3e   :  { %v3315_v17 = vadd.f32 %v1231_v16, %v1225_v15 }
0x2c3f   :  { %v1745_v18 = vpop.permute.xlu0 %1744 }
0x2c40   :  { %v1747_v19 = vsel %vm245_vm2, %v1745_v18, 0.0 }
0x2c41   :  { %1748 = vadd.xlane.f32.xlu0 %v1747_v19 }
0x2c45   :  { %1883 = vadd.xlane.f32.xlu0 %v1882_v20 }
0x2c49   :  { %2018 = vadd.xlane.f32.xlu0 %v2017_v21  ;;  %v1614_v22 = vpop.xlane.xlu1 %1613 }
0x2c4a   :  { %v1615_v26 = vadd.f32 %v3305_v40, %v1614_v22 }
0x2c6c   :  { %v1479_v23 = vpop.xlane.xlu0 %1478 }
0x2c6d   :  { %v1480_v25 = vadd.f32 %v3305_v40, %v1479_v23 }
0x2c6f   :  { %v1481_v27 = vmax.f32 %v1346_v57, %v1480_v25 }
0x2c71   :  { %v1482_v14 = vsub.f32 %v1346_v57, %v1481_v27  ;;  %v1485_v37 = vsub.f32 %v1480_v25, %v1481_v27  ;;  %v1616_v29 = vmax.f32 %v1481_v27, %v1615_v26 }
0x2c73   :  { %v1483_v30 = vmul.f32 1.442695, %v1482_v14  ;;  %v1486_v31 = vmul.f32 1.442695, %v1485_v37  ;;  %v1617_v33 = vsub.f32 %v1481_v27, %v1616_v29  ;;  %v1620_v34 = vsub.f32 %v1615_v26, %v1616_v29 }
0x2c75   :  { %2823 = vpow2.f32 %v1483_v30  ;;  %v1618_v35 = vmul.f32 1.442695, %v1617_v33  ;;  %v1621_v36 = vmul.f32 1.442695, %v1620_v34 }
0x2c76   :  { %2825 = vpow2.f32 %v1486_v31 }
0x2c77   :  { %2827 = vpow2.f32 %v1618_v35 }
0x2c78   :  { %2829 = vpow2.f32 %v1621_v36 }
0x2c7f   :  { %v2824_v38 = vpop.eup %2823 }
0x2c80   :  { %v2826_v48 = vpop.eup %2825  ;;  %v1488_v11 = vmul.f32 %v2824_v38, %v1354_v2  ;;  %1492 = vperm.xlu1 %2686, %v2824_v38  }
0x2c81   :  { %1498 = vperm.xlu0 %2685, %v2826_v48   ;;  %v2828_v52 = vpop.eup %2827 }
0x2c82   :  { %v1489_v5 = vadd.f32 %v2826_v48, %v1488_v11  ;;  %v2830_v42 = vpop.eup %2829 }
0x2c84   :  { %v1623_v41 = vmul.f32 %v2828_v52, %v1489_v5  ;;  %1627 = vperm.xlu1 %2686, %v2828_v52  }
0x2c86   :  { %v1624_v43 = vadd.f32 %v2830_v42, %v1623_v41 }
0x2c88   :  { %1633 = vperm.xlu1 %2686, %v2830_v42  }
0x2c99   :  { %v2154_v57 = vpop.xlane.xlu1 %2153 }
0x2c9a   :  { %v2155_v61 = vadd.f32 %v3305_v40, %v2154_v57 }
0x2c9d   :  { %v1358_v34 = vpop.permute.xlu1 %1357 }
0x2c9e   :  { %v1360_v48 = vmul.f32 %v1358_v34, %v3315_v17 }
0x2ca1   :  { %v1364_v35 = vpop.permute.xlu1 %1363 }
0x2ca2   :  { %v1366_v38 = vmul.f32 %v1364_v35, %v3183_v32 }
0x2ca4   :  { %v1367_v52 = vadd.f32 %v1366_v38, %v1360_v48 }
0x2cce   :  { %v1749_v45 = vpop.xlane.xlu0 %1748 }
0x2ccf   :  { %v1750_v46 = vadd.f32 %v3305_v40, %v1749_v45 }
0x2cd1   :  { %v1751_v47 = vmax.f32 %v1616_v29, %v1750_v46 }
0x2cd2   :  { %v1884_v49 = vpop.xlane.xlu0 %1883 }
0x2cd3   :  { %v1752_v50 = vsub.f32 %v1616_v29, %v1751_v47  ;;  %v1755_v51 = vsub.f32 %v1750_v46, %v1751_v47  ;;  %v1885_v54 = vadd.f32 %v3305_v40, %v1884_v49 }
0x2cd5   :  { %v1753_v8 = vmul.f32 1.442695, %v1752_v50  ;;  %v1756_v55 = vmul.f32 1.442695, %v1755_v51  ;;  %v1886_v56 = vmax.f32 %v1751_v47, %v1885_v54 }
0x2cd6   :  { %v2019_v58 = vpop.xlane.xlu0 %2018 }
0x2cd7   :  { %2831 = vpow2.f32 %v1753_v8  ;;  %v1887_v13 = vsub.f32 %v1751_v47, %v1886_v56  ;;  %v1890_v59 = vsub.f32 %v1885_v54, %v1886_v56  ;;  %v2020_v60 = vadd.f32 %v3305_v40, %v2019_v58 }
0x2cd8   :  { %2833 = vpow2.f32 %v1756_v55 }
0x2cd9   :  { %v1888_v62 = vmul.f32 1.442695, %v1887_v13  ;;  %v1891_v0 = vmul.f32 1.442695, %v1890_v59  ;;  %v2021_v1 = vmax.f32 %v1886_v56, %v2020_v60 }
0x2cdb   :  { %2835 = vpow2.f32 %v1888_v62  ;;  %v2022_v2 = vsub.f32 %v1886_v56, %v2021_v1  ;;  %v2025_v3 = vsub.f32 %v2020_v60, %v2021_v1  ;;  %v2156_v4 = vmax.f32 %v2021_v1, %v2155_v61 }
0x2cdc   :  { %2837 = vpow2.f32 %v1891_v0 }
0x2cdd   :  { %v2023_v7 = vmul.f32 1.442695, %v2022_v2  ;;  %v2026_v9 = vmul.f32 1.442695, %v2025_v3  ;;  %v2157_v10 = vsub.f32 %v2021_v1, %v2156_v4  ;;  %v2160_v12 = vsub.f32 %v2155_v61, %v2156_v4 }
0x2cdf   :  { %2839 = vpow2.f32 %v2023_v7  ;;  %v2158_v15 = vmul.f32 1.442695, %v2157_v10  ;;  %v2161_v18 = vmul.f32 1.442695, %v2160_v12 }
0x2ce0   :  { %2841 = vpow2.f32 %v2026_v9 }
0x2ce1   :  { %v2832_v16 = vpop.eup %2831  ;;  %2843 = vpow2.f32 %v2158_v15 }
0x2ce2   :  { %v2834_v19 = vpop.eup %2833  ;;  %v1758_v20 = vmul.f32 %v2832_v16, %v1624_v43  ;;  %1762 = vperm.xlu0 %2685, %v2832_v16   ;;  %2845 = vpow2.f32 %v2161_v18 }
0x2ce3   :  { %1768 = vperm.xlu1 %2686, %v2834_v19  }
0x2ce4   :  { %v1759_v40 = vadd.f32 %v2834_v19, %v1758_v20 }
0x2ce5   :  { %v2836_v21 = vpop.eup %2835 }
0x2ce6   :  { %v2838_v22 = vpop.eup %2837  ;;  %v1893_v23 = vmul.f32 %v2836_v21, %v1759_v40  ;;  %1897 = vperm.xlu0 %2685, %v2836_v21  }
0x2ce7   :  { %1903 = vperm.xlu1 %2686, %v2838_v22  }
0x2ce8   :  { %v1894_v25 = vadd.f32 %v2838_v22, %v1893_v23 }
0x2ce9   :  { %v2840_v26 = vpop.eup %2839 }
0x2cea   :  { %v2842_v27 = vpop.eup %2841  ;;  %2032 = vperm.xlu0 %2685, %v2840_v26   ;;  %v2028_v14 = vmul.f32 %v2840_v26, %v1894_v25 }
0x2ceb   :  { %2038 = vperm.xlu1 %2686, %v2842_v27   ;;  %v2844_v29 = vpop.eup %2843 }
0x2cec   :  { %v2029_v37 = vadd.f32 %v2842_v27, %v2028_v14  ;;  %v2846_v31 = vpop.eup %2845 }
0x2cee   :  { %2142 = vrot.lane.b32.xlu0 %v3301_v39, %s2901_s5  ;;  %v2163_v30 = vmul.f32 %v2844_v29, %v2029_v37 }
0x2cef   :  { %2167 = vperm.xlu1 %2686, %v2844_v29  }
0x2cf0   :  { %v2164_v33 = vadd.f32 %v2846_v31, %v2163_v30 }
0x2cf2   :  { %2173 = vperm.xlu0 %2685, %v2846_v31  }
0x2cf3   :  { %2180 = vperm.xlu1 %2686, %v2164_v33  }
0x2cf7   :  { %2193 = vrot.lane.b32.xlu1 %v3286_v24, %s2902_s29 }
0x2cff   :  { %v1493_v36 = vpop.permute.xlu1 %1492 }
0x2d00   :  { %v1499_v11 = vpop.permute.xlu0 %1498  ;;  %v1495_v41 = vmul.f32 %v1493_v36, %v1367_v52 }
0x2d01   :  { %v1501_v42 = vmul.f32 %v1499_v11, %v3201_v53 }
0x2d03   :  { %v1628_v5 = vpop.permute.xlu1 %1627  ;;  %v1502_v45 = vadd.f32 %v1501_v42, %v1495_v41 }
0x2d05   :  { %v1630_v47 = vmul.f32 %v1628_v5, %v1502_v45 }
0x2d07   :  { %v1634_v43 = vpop.permute.xlu1 %1633 }
0x2d08   :  { %v1636_v46 = vmul.f32 %v1634_v43, %v3219_v6 }
0x2d0a   :  { %v1637_v49 = vadd.f32 %v1636_v46, %v1630_v47 }
0x2d61   :  { %v1763_v24 = vpop.permute.xlu0 %1762 }
0x2d62   :  { %v1769_v50 = vpop.permute.xlu1 %1768  ;;  %v1765_v51 = vmul.f32 %v1763_v24, %v1637_v49 }
0x2d63   :  { %v1771_v54 = vmul.f32 %v1769_v50, %v3236_v28 }
0x2d65   :  { %v1898_v32 = vpop.permute.xlu0 %1897  ;;  %v1772_v17 = vadd.f32 %v1771_v54, %v1765_v51 }
0x2d66   :  { %v1904_v8 = vpop.permute.xlu1 %1903 }
0x2d67   :  { %v1906_v56 = vmul.f32 %v1904_v8, %v3253_v44  ;;  %v1900_v57 = vmul.f32 %v1898_v32, %v1772_v17 }
0x2d69   :  { %v2033_v55 = vpop.permute.xlu0 %2032  ;;  %v1907_v13 = vadd.f32 %v1906_v56, %v1900_v57 }
0x2d6a   :  { %v2039_v58 = vpop.permute.xlu1 %2038 }
0x2d6b   :  { %v2041_v6 = vmul.f32 %v2039_v58, %v3265_v63  ;;  %v2035_v28 = vmul.f32 %v2033_v55, %v1907_v13 }
0x2d6d   :  { %v2143_v53 = vpop.permute.xlu0 %2142 }
0x2d6e   :  { %v2168_v59 = vpop.permute.xlu1 %2167  ;;  %2282 = vst.msk [vmem:[%s3386_s9 + $0xe] sm:$0x3] %vm245_vm2, %v2143_v53  ;;  %2191 = vst.msk [vmem:[#allocation5 + $0x2] sm:$0x3] %vm245_vm2, %v2143_v53 }
0x2d72   :  { %v2181_v60 = vpop.permute.xlu1 %2180 }
0x2d73   :  { %2847 = vrcp.f32 %v2181_v60 }
0x2d74   :  { %2860 = shalt.err (!%p2857_p4)
}
0x2d75   :  { %s2861_s15 = scalar_lea.hbm %s3388_s11, 64 }
0x2d76   :  { %p2862_p5 = scmp.ne.s32.totalorder %s3388_s11, %s2861_s15  ;;  %p2865_p6 = scmp.lt.u32.totalorder %s2861_s15, %s3388_s11 }
0x2d78   :  { %p2867_p7 = pnand %p2865_p6, %p2862_p5 }
0x2d7a   :  { %2870 = shalt.err (!%p2867_p7)
}
0x2d7b   :  { %s2906_s0 = smov 2   ;;  %v2174_v44 = vpop.permute.xlu0 %2173  ;;  %v2042_v63 = vadd.f32 %v2041_v6, %v2035_v28  ;;  %v2194_v61 = vpop.permute.xlu1 %2193  ;;  %s2871_s21 = scalar_lea.vmem %s2220_s2, 64 }
0x2d7c   :  { %2213 = dma.vmem_to_hbm [thread:$0]  %s2208_s13, 64, %s3388_s11, [#allocation6], %s2901_s5, %s2901_s5, %s2906_s0   ;;  %2197 = vst.msk [vmem:[#allocation7 + $0x2] sm:$0x3] %vm245_vm2, %v2194_v61  ;;  %v2176_v62 = vmul.f32 %v2174_v44, %v3301_v39 }
0x2d7d   :  { %p2872_p8 = scmp.ne.s32.totalorder %s2220_s2, %s2871_s21  ;;  %p2876_p9 = scmp.lt.s32.totalorder %s2220_s2, %s2220_s2 }
0x2d7e   :  { %p2877_p10 = scmp.lt.s32.totalorder %s2871_s21, %s2871_s21 }
0x2d80   :  { %p2878_p11 = por %p2877_p10, %p2876_p9 }
0x2d82   :  { %p2879_p12 = pnand %p2878_p11, %p2872_p8 }
0x2d84   :  { %2882 = shalt.err (!%p2879_p12)
}
0x2d85   :  { %s2883_s24 = scalar_lea.hbm %s3389_s12, 64 }
0x2d86   :  { %p2884_p13 = scmp.ne.s32.totalorder %s3389_s12, %s2883_s24  ;;  %p2887_p0 = scmp.lt.u32.totalorder %s2883_s24, %s3389_s12 }
0x2d88   :  { %p2889_p1 = pnand %p2887_p0, %p2884_p13 }
0x2d8a   :  { %2892 = shalt.err (!%p2889_p1)
}
0x2d8b   :  { %2225 = dma.vmem_to_hbm [thread:$0]  %s2220_s2, 64, %s3389_s12, [#allocation8], %s2901_s5, %s2901_s5, %s2906_s0   ;;  %v2170_v39 = vmul.f32 %v2168_v59, %v2042_v63  ;;  %v2848_v1 = vpop.eup %2847 }
0x2d8d   :  { %v2177_v0 = vadd.f32 %v2176_v62, %v2170_v39 }
0x2d8f   :  { %v2184_v2 = vmul.f32 %v2848_v1, %v2177_v0 }
0x2d91   :  { %2186 = vrot.lane.b32.xlu0 %v2184_v2, %s2901_s5 }
0x2e03   :  { %v2187_v3 = vpop.permute.xlu0 %2186 }
0x2e04   :  { %2189 = vst.msk [vmem:[%s3387_s10] sm:$0x3] %vm245_vm2, %v2187_v3 }
0x2e05   :  { %2893 = dma.done.wait [#allocation6], 64  }
0x2e06   :  { %2894 = vsyncadd [#allocation6], 4294967232 }
0x2e07   :  { %2895 = dma.done.wait [#allocation8], 64  }
0x2e08   :  { %2896 = vsyncadd [#allocation8], 4294967232 }
0x2e09   :  { %2236 = vsyncpa [#allocation6], 1 }
0x2e0a   :  { %2237 = vsyncpa [#allocation8], 1 }

</bundles_post_ra>
